<compile_context>
chip_gen: v7x
topology: tpu7x:2x2x1
jax: 0.10.0
libtpu: 0.0.40
codegen_flags: <defaults>
</compile_context>

<pallas_src>
import jax
import jax.numpy as jnp
from jax.experimental import pallas as pl
from jax.experimental.pallas import tpu as pltpu

# ---- model dimensions (match the PyTorch module defaults) -------------------
IMG_C, IMG_H, IMG_W = 3, 16, 16           # small synthetic image
IMG_FLAT = IMG_C * IMG_H * IMG_W          # 768
RESNET_FEAT = 512                         # resnet.fc.in_features
TEXT_DIM = 768                            # DistilBert config.dim
EMBED_DIM = 512                           # embedding_dim
HIDDEN_DIM = 256                          # hidden_dim
NUM_CLASSES = 3
OUT_DIM = NUM_CLASSES * 8                 # 24
OUT_PAD = 128                             # lane-dense padded logits width
SEQ_LEN = 8
VOCAB = 100
VOCAB_PAD = 128                           # lane-dense padded vocab (count matrix)

TILE_B_MAX = 512                          # big batch tile (fits VMEM everywhere)


def _round_up(x, m):
    return (x + m - 1) // m * m


def _fused_kernel(img_ref, cnt_ref,
                  w_img_ref, b_img_ref,
                  w_txt_ref, b_txt_ref,
                  w1i_ref, w1t_ref, b1_ref,
                  w2_ref, b2_ref,
                  out_ref):
    f32 = jnp.float32
    bf16 = jnp.bfloat16

    # ---- image branch: folded (flatten-linear stand-in o image_fc) ----------
    # [TB, 768] @ [768, 512] -> [TB, 512]
    img_feat = jnp.dot(img_ref[...], w_img_ref[...],
                       preferred_element_type=f32) + b_img_ref[...]

    # ---- text branch: normalized token counts @ (emb_table @ w_tfc) ---------
    # [TB, 128] @ [128, 512] -> [TB, 512]
    text_feat = jnp.dot(cnt_ref[...], w_txt_ref[...],
                        preferred_element_type=f32) + b_txt_ref[...]

    # ---- classifier: ReLU -> Linear(1024,256) -> ReLU -> Linear(256,24pad) --
    # ReLU(concat(a, b)) @ W1 == ReLU(a) @ W1[:512] + ReLU(b) @ W1[512:]
    img_h = jnp.maximum(img_feat, 0.0).astype(bf16)
    txt_h = jnp.maximum(text_feat, 0.0).astype(bf16)
    h = (jnp.dot(img_h, w1i_ref[...], preferred_element_type=f32)
         + jnp.dot(txt_h, w1t_ref[...], preferred_element_type=f32)
         + b1_ref[...])
    h = jnp.maximum(h, 0.0).astype(bf16)
    out_ref[...] = jnp.dot(h, w2_ref[...],
                           preferred_element_type=f32) + b2_ref[...]


def prepare_params(params):
    """One-time algebraic folds / padding / casts (all composition in f32)."""
    f32 = jnp.float32
    bf16 = jnp.bfloat16

    # fold image-encoder stand-in + image_fc (no nonlinearity between them)
    w_img = params["w_ienc"].astype(f32) @ params["w_ifc"].astype(f32)      # [768,512]
    b_img = (params["b_ienc"].astype(f32) @ params["w_ifc"].astype(f32)
             + params["b_ifc"].astype(f32))                                 # [1,512]

    # fold embedding table into text_fc: E' = emb_table @ w_tfc, pad vocab->128
    e_txt = params["emb_table"].astype(f32) @ params["w_tfc"].astype(f32)   # [100,512]
    w_txt = jnp.pad(e_txt, ((0, VOCAB_PAD - VOCAB), (0, 0)))                # [128,512]

    # split W1 so the kernel never materializes the concat buffer
    w1i = params["w_cls1"][:EMBED_DIM]                                      # [512,256]
    w1t = params["w_cls1"][EMBED_DIM:]                                      # [512,256]

    # pad the final layer to a lane-dense 128-wide output
    w2 = jnp.pad(params["w_cls2"], ((0, 0), (0, OUT_PAD - OUT_DIM)))        # [256,128]
    b2 = jnp.pad(params["b_cls2"], ((0, 0), (0, OUT_PAD - OUT_DIM)))        # [1,128]

    return dict(
        w_img=w_img.astype(bf16), b_img=b_img.astype(f32),
        w_txt=w_txt.astype(bf16), b_txt=params["b_tfc"].astype(f32),
        w1i=w1i.astype(bf16), w1t=w1t.astype(bf16),
        b1=params["b_cls1"].astype(f32),
        w2=w2.astype(bf16), b2=b2.astype(f32),
    )


def multimodal_fabric_classifier(images, input_ids, attention_mask, prepared):
    """images: [B,3,H,W] f32 (NCHW), input_ids: [B,S] i32, attention_mask: [B,S]."""
    B = images.shape[0]
    bf16 = jnp.bfloat16

    # ---- wrapper glue (outside the kernel) ----------------------------------
    # image: flatten to [B, 768], cast to bf16 BEFORE padding
    img_flat = images.reshape(B, -1).astype(bf16)

    # text: normalized mask-weighted token-count matrix [B, 100]
    mask = attention_mask.astype(jnp.float32)                               # [B,S]
    onehot = jax.nn.one_hot(input_ids, VOCAB, dtype=jnp.float32)            # [B,S,V]
    counts = jnp.einsum("bs,bsv->bv", mask, onehot)                         # [B,V]
    denom = jnp.maximum(jnp.sum(mask, axis=1, keepdims=True), 1e-6)
    cnt_norm = (counts / denom).astype(bf16)                                # [B,100]

    # batch padding / tiling: bf16 rows pack 2/sublane -> round to 16;
    # when possible make grid >= 2 so v7x can use both TensorCores.
    b_pad = _round_up(B, 16)
    if b_pad >= 32:
        tile_b = min(TILE_B_MAX, _round_up(b_pad // 2, 16))
    else:
        tile_b = b_pad
    b_pad = _round_up(b_pad, tile_b)
    grid = (b_pad // tile_b,)

    img_in = jnp.pad(img_flat, ((0, b_pad - B), (0, 0)))                    # [b_pad,768]
    cnt_in = jnp.pad(cnt_norm, ((0, b_pad - B), (0, VOCAB_PAD - VOCAB)))    # [b_pad,128]

    def act_spec(cols):
        return pl.BlockSpec((tile_b, cols), lambda i: (i, 0))

    def resident(shape):
        return pl.BlockSpec(shape, lambda i: (0, 0))

    kernel_args = (
        img_in, cnt_in,
        prepared["w_img"], prepared["b_img"],
        prepared["w_txt"], prepared["b_txt"],
        prepared["w1i"], prepared["w1t"], prepared["b1"],
        prepared["w2"], prepared["b2"],
    )
    in_specs = [
        act_spec(IMG_FLAT),                                   # img
        act_spec(VOCAB_PAD),                                  # token counts
        resident((IMG_FLAT, EMBED_DIM)), resident((1, EMBED_DIM)),
        resident((VOCAB_PAD, EMBED_DIM)), resident((1, EMBED_DIM)),
        resident((EMBED_DIM, HIDDEN_DIM)), resident((EMBED_DIM, HIDDEN_DIM)),
        resident((1, HIDDEN_DIM)),
        resident((HIDDEN_DIM, OUT_PAD)), resident((1, OUT_PAD)),
    ]

    logits_pad = pl.pallas_call(
        _fused_kernel,
        out_shape=jax.ShapeDtypeStruct((b_pad, OUT_PAD), jnp.float32),
        grid=grid,
        in_specs=in_specs,
        out_specs=pl.BlockSpec((tile_b, OUT_PAD), lambda i: (i, 0)),
        compiler_params=pltpu.CompilerParams(
            dimension_semantics=("parallel",),
            vmem_limit_bytes=32 << 20,
        ),
    )(*kernel_args)

    logits = logits_pad[:B, :OUT_DIM]                                       # [B, 24]
    return logits.reshape(-1, NUM_CLASSES, 8)                               # [B, 3, 8]


def init_params(key):
    ks = jax.random.split(key, 12)

    def lin(kw, kb, fan_in, fan_out):
        scale = 1.0 / jnp.sqrt(jnp.float32(fan_in))
        w = jax.random.uniform(kw, (fan_in, fan_out), jnp.float32, -scale, scale)
        b = jax.random.uniform(kb, (1, fan_out), jnp.float32, -scale, scale)
        return w, b

    w_ienc, b_ienc = lin(ks[0], ks[1], IMG_FLAT, RESNET_FEAT)      # image encoder stand-in
    w_ifc, b_ifc = lin(ks[2], ks[3], RESNET_FEAT, EMBED_DIM)       # image_fc
    w_tfc, b_tfc = lin(ks[4], ks[5], TEXT_DIM, EMBED_DIM)          # text_fc
    w_cls1, b_cls1 = lin(ks[6], ks[7], 2 * EMBED_DIM, HIDDEN_DIM)  # classifier[1]
    w_cls2, b_cls2 = lin(ks[8], ks[9], HIDDEN_DIM, OUT_DIM)        # classifier[3]
    emb_table = jax.random.normal(ks[10], (VOCAB, TEXT_DIM), jnp.float32) * 0.02

    return dict(
        w_ienc=w_ienc, b_ienc=b_ienc,
        w_ifc=w_ifc, b_ifc=b_ifc,
        w_tfc=w_tfc, b_tfc=b_tfc,
        w_cls1=w_cls1, b_cls1=b_cls1,
        w_cls2=w_cls2, b_cls2=b_cls2,
        emb_table=emb_table,
    )


if __name__ == "__main__":
    key = jax.random.PRNGKey(0)
    k_img, k_ids, k_params = jax.random.split(key, 3)

    B = 2
    images = jax.random.normal(k_img, (B, IMG_C, IMG_H, IMG_W), jnp.float32)
    input_ids = jax.random.randint(k_ids, (B, SEQ_LEN), 0, VOCAB, jnp.int32)
    attention_mask = jnp.ones((B, SEQ_LEN), jnp.int32)

    params = init_params(k_params)
    prepared = prepare_params(params)

    logits = multimodal_fabric_classifier(images, input_ids, attention_mask, prepared)
    logits = jax.block_until_ready(logits)

    assert logits.shape == (B, NUM_CLASSES, 8), logits.shape
    assert logits.dtype == jnp.float32
    print("KERNEL_OK")
</pallas_src>

<mosaic_0001>
module attributes {stable_mosaic.version = 11 : i64} {
  func.func @_fused_kernel(%arg0: i32, %arg1: memref<16x768xbf16, #tpu.memory_space<vmem>>, %arg2: memref<16x128xbf16, #tpu.memory_space<vmem>>, %arg3: memref<768x512xbf16, #tpu.memory_space<vmem>>, %arg4: memref<1x512xf32, #tpu.memory_space<vmem>>, %arg5: memref<128x512xbf16, #tpu.memory_space<vmem>>, %arg6: memref<1x512xf32, #tpu.memory_space<vmem>>, %arg7: memref<512x256xbf16, #tpu.memory_space<vmem>>, %arg8: memref<512x256xbf16, #tpu.memory_space<vmem>>, %arg9: memref<1x256xf32, #tpu.memory_space<vmem>>, %arg10: memref<256x128xbf16, #tpu.memory_space<vmem>>, %arg11: memref<1x128xf32, #tpu.memory_space<vmem>>, %arg12: memref<16x128xf32, #tpu.memory_space<vmem>>) attributes {dimension_semantics = [#tpu.dimension_semantics<parallel>], iteration_bounds = array<i64: 1>, scalar_prefetch = 0 : i64, scratch_operands = 0 : i64, tpu.core_type = #tpu.core_type<tc>, window_params = [{transform_indices = @transform_0, window_bounds = array<i64: 16, 768>}, {transform_indices = @transform_1, window_bounds = array<i64: 16, 128>}, {pipeline_mode = #tpu.pipeline_mode<synchronous>, transform_indices = @transform_2, window_bounds = array<i64: 768, 512>}, {pipeline_mode = #tpu.pipeline_mode<synchronous>, transform_indices = @transform_3, window_bounds = array<i64: 1, 512>}, {pipeline_mode = #tpu.pipeline_mode<synchronous>, transform_indices = @transform_4, window_bounds = array<i64: 128, 512>}, {pipeline_mode = #tpu.pipeline_mode<synchronous>, transform_indices = @transform_5, window_bounds = array<i64: 1, 512>}, {pipeline_mode = #tpu.pipeline_mode<synchronous>, transform_indices = @transform_6, window_bounds = array<i64: 512, 256>}, {pipeline_mode = #tpu.pipeline_mode<synchronous>, transform_indices = @transform_7, window_bounds = array<i64: 512, 256>}, {pipeline_mode = #tpu.pipeline_mode<synchronous>, transform_indices = @transform_8, window_bounds = array<i64: 1, 256>}, {pipeline_mode = #tpu.pipeline_mode<synchronous>, transform_indices = @transform_9, window_bounds = array<i64: 256, 128>}, {pipeline_mode = #tpu.pipeline_mode<synchronous>, transform_indices = @transform_10, window_bounds = array<i64: 1, 128>}, {transform_indices = @transform_11, window_bounds = array<i64: 16, 128>}]} {
    %c0 = arith.constant 0 : index
    %c0_0 = arith.constant 0 : index
    %0 = vector.load %arg1[%c0, %c0_0] : memref<16x768xbf16, #tpu.memory_space<vmem>>, vector<16x768xbf16>
    %c0_1 = arith.constant 0 : index
    %c0_2 = arith.constant 0 : index
    %1 = vector.load %arg3[%c0_1, %c0_2] : memref<768x512xbf16, #tpu.memory_space<vmem>>, vector<768x512xbf16>
    %cst = arith.constant dense<0.000000e+00> : vector<16x512xf32>
    %2 = tpu.matmul %0, %1, %cst {dimension_numbers = #tpu.dot_dimension_numbers<[1], [0], [0], [1], [0, 0, 1, 1], [], []>} : vector<16x768xbf16>, vector<768x512xbf16>, vector<16x512xf32> -> vector<16x512xf32>
    %c0_3 = arith.constant 0 : index
    %c0_4 = arith.constant 0 : index
    %3 = vector.load %arg4[%c0_3, %c0_4] : memref<1x512xf32, #tpu.memory_space<vmem>>, vector<1x512xf32>
    %4 = vector.broadcast %3 : vector<1x512xf32> to vector<16x512xf32>
    %5 = arith.addf %2, %4 : vector<16x512xf32>
    %c0_5 = arith.constant 0 : index
    %c0_6 = arith.constant 0 : index
    %6 = vector.load %arg2[%c0_5, %c0_6] : memref<16x128xbf16, #tpu.memory_space<vmem>>, vector<16x128xbf16>
    %c0_7 = arith.constant 0 : index
    %c0_8 = arith.constant 0 : index
    %7 = vector.load %arg5[%c0_7, %c0_8] : memref<128x512xbf16, #tpu.memory_space<vmem>>, vector<128x512xbf16>
    %cst_9 = arith.constant dense<0.000000e+00> : vector<16x512xf32>
    %8 = tpu.matmul %6, %7, %cst_9 {dimension_numbers = #tpu.dot_dimension_numbers<[1], [0], [0], [1], [0, 0, 1, 1], [], []>} : vector<16x128xbf16>, vector<128x512xbf16>, vector<16x512xf32> -> vector<16x512xf32>
    %c0_10 = arith.constant 0 : index
    %c0_11 = arith.constant 0 : index
    %9 = vector.load %arg6[%c0_10, %c0_11] : memref<1x512xf32, #tpu.memory_space<vmem>>, vector<1x512xf32>
    %10 = vector.broadcast %9 : vector<1x512xf32> to vector<16x512xf32>
    %11 = arith.addf %8, %10 : vector<16x512xf32>
    %cst_12 = arith.constant 0.000000e+00 : f32
    %12 = vector.broadcast %cst_12 : f32 to vector<16x512xf32>
    %13 = arith.maximumf %5, %12 : vector<16x512xf32>
    %14 = arith.truncf %13 : vector<16x512xf32> to vector<16x512xbf16>
    %cst_13 = arith.constant 0.000000e+00 : f32
    %15 = vector.broadcast %cst_13 : f32 to vector<16x512xf32>
    %16 = arith.maximumf %11, %15 : vector<16x512xf32>
    %17 = arith.truncf %16 : vector<16x512xf32> to vector<16x512xbf16>
    %c0_14 = arith.constant 0 : index
    %c0_15 = arith.constant 0 : index
    %18 = vector.load %arg7[%c0_14, %c0_15] : memref<512x256xbf16, #tpu.memory_space<vmem>>, vector<512x256xbf16>
    %cst_16 = arith.constant dense<0.000000e+00> : vector<16x256xf32>
    %19 = tpu.matmul %14, %18, %cst_16 {dimension_numbers = #tpu.dot_dimension_numbers<[1], [0], [0], [1], [0, 0, 1, 1], [], []>} : vector<16x512xbf16>, vector<512x256xbf16>, vector<16x256xf32> -> vector<16x256xf32>
    %c0_17 = arith.constant 0 : index
    %c0_18 = arith.constant 0 : index
    %20 = vector.load %arg8[%c0_17, %c0_18] : memref<512x256xbf16, #tpu.memory_space<vmem>>, vector<512x256xbf16>
    %cst_19 = arith.constant dense<0.000000e+00> : vector<16x256xf32>
    %21 = tpu.matmul %17, %20, %cst_19 {dimension_numbers = #tpu.dot_dimension_numbers<[1], [0], [0], [1], [0, 0, 1, 1], [], []>} : vector<16x512xbf16>, vector<512x256xbf16>, vector<16x256xf32> -> vector<16x256xf32>
    %22 = arith.addf %19, %21 : vector<16x256xf32>
    %c0_20 = arith.constant 0 : index
    %c0_21 = arith.constant 0 : index
    %23 = vector.load %arg9[%c0_20, %c0_21] : memref<1x256xf32, #tpu.memory_space<vmem>>, vector<1x256xf32>
    %24 = vector.broadcast %23 : vector<1x256xf32> to vector<16x256xf32>
    %25 = arith.addf %22, %24 : vector<16x256xf32>
    %cst_22 = arith.constant 0.000000e+00 : f32
    %26 = vector.broadcast %cst_22 : f32 to vector<16x256xf32>
    %27 = arith.maximumf %25, %26 : vector<16x256xf32>
    %28 = arith.truncf %27 : vector<16x256xf32> to vector<16x256xbf16>
    %c0_23 = arith.constant 0 : index
    %c0_24 = arith.constant 0 : index
    %29 = vector.load %arg10[%c0_23, %c0_24] : memref<256x128xbf16, #tpu.memory_space<vmem>>, vector<256x128xbf16>
    %cst_25 = arith.constant dense<0.000000e+00> : vector<16x128xf32>
    %30 = tpu.matmul %28, %29, %cst_25 {dimension_numbers = #tpu.dot_dimension_numbers<[1], [0], [0], [1], [0, 0, 1, 1], [], []>} : vector<16x256xbf16>, vector<256x128xbf16>, vector<16x128xf32> -> vector<16x128xf32>
    %c0_26 = arith.constant 0 : index
    %c0_27 = arith.constant 0 : index
    %31 = vector.load %arg11[%c0_26, %c0_27] : memref<1x128xf32, #tpu.memory_space<vmem>>, vector<1x128xf32>
    %32 = vector.broadcast %31 : vector<1x128xf32> to vector<16x128xf32>
    %33 = arith.addf %30, %32 : vector<16x128xf32>
    %c0_28 = arith.constant 0 : index
    %c0_29 = arith.constant 0 : index
    %34 = vector.load %arg12[%c0_28, %c0_29] : memref<16x128xf32, #tpu.memory_space<vmem>>, vector<16x128xf32>
    tpu.vector_store %arg12[%c0_28, %c0_29], %33 {strides = array<i32>} : memref<16x128xf32, #tpu.memory_space<vmem>>, vector<16x128xf32>,
    return
  }
  func.func @transform_0(%arg0: i32) -> (i32, i32) {
    %c0_i32 = arith.constant 0 : i32
    %c0_i32_0 = arith.constant 0 : i32
    return %arg0, %c0_i32 : i32, i32
  }
  func.func @transform_1(%arg0: i32) -> (i32, i32) {
    %c0_i32 = arith.constant 0 : i32
    %c0_i32_0 = arith.constant 0 : i32
    return %arg0, %c0_i32 : i32, i32
  }
  func.func @transform_2(%arg0: i32) -> (i32, i32) {
    %c0_i32 = arith.constant 0 : i32
    %c0_i32_0 = arith.constant 0 : i32
    %c0_i32_1 = arith.constant 0 : i32
    return %c0_i32, %c0_i32_0 : i32, i32
  }
  func.func @transform_3(%arg0: i32) -> (i32, i32) {
    %c0_i32 = arith.constant 0 : i32
    %c0_i32_0 = arith.constant 0 : i32
    %c0_i32_1 = arith.constant 0 : i32
    return %c0_i32, %c0_i32_0 : i32, i32
  }
  func.func @transform_4(%arg0: i32) -> (i32, i32) {
    %c0_i32 = arith.constant 0 : i32
    %c0_i32_0 = arith.constant 0 : i32
    %c0_i32_1 = arith.constant 0 : i32
    return %c0_i32, %c0_i32_0 : i32, i32
  }
  func.func @transform_5(%arg0: i32) -> (i32, i32) {
    %c0_i32 = arith.constant 0 : i32
    %c0_i32_0 = arith.constant 0 : i32
    %c0_i32_1 = arith.constant 0 : i32
    return %c0_i32, %c0_i32_0 : i32, i32
  }
  func.func @transform_6(%arg0: i32) -> (i32, i32) {
    %c0_i32 = arith.constant 0 : i32
    %c0_i32_0 = arith.constant 0 : i32
    %c0_i32_1 = arith.constant 0 : i32
    return %c0_i32, %c0_i32_0 : i32, i32
  }
  func.func @transform_7(%arg0: i32) -> (i32, i32) {
    %c0_i32 = arith.constant 0 : i32
    %c0_i32_0 = arith.constant 0 : i32
    %c0_i32_1 = arith.constant 0 : i32
    return %c0_i32, %c0_i32_0 : i32, i32
  }
  func.func @transform_8(%arg0: i32) -> (i32, i32) {
    %c0_i32 = arith.constant 0 : i32
    %c0_i32_0 = arith.constant 0 : i32
    %c0_i32_1 = arith.constant 0 : i32
    return %c0_i32, %c0_i32_0 : i32, i32
  }
  func.func @transform_9(%arg0: i32) -> (i32, i32) {
    %c0_i32 = arith.constant 0 : i32
    %c0_i32_0 = arith.constant 0 : i32
    %c0_i32_1 = arith.constant 0 : i32
    return %c0_i32, %c0_i32_0 : i32, i32
  }
  func.func @transform_10(%arg0: i32) -> (i32, i32) {
    %c0_i32 = arith.constant 0 : i32
    %c0_i32_0 = arith.constant 0 : i32
    %c0_i32_1 = arith.constant 0 : i32
    return %c0_i32, %c0_i32_0 : i32, i32
  }
  func.func @transform_11(%arg0: i32) -> (i32, i32) {
    %c0_i32 = arith.constant 0 : i32
    %c0_i32_0 = arith.constant 0 : i32
    return %arg0, %c0_i32 : i32, i32
  }
}

</mosaic_0001>

<bundles_post_ra>
// kernel: tpu_custom_call.1
= control target key start
LH: loop header
LB: loop body
LE: loop exit
PB: predicated region body
PF: predicated region fallthrough
CT: control target
= control target key end

     0   :  { %16 = vsyncpa [#allocation3], 0  ;;  %s4576_s0 = inlined_call_operand.hbm [shape: bf16[16,768], index: 0, kind: input, shape index: {}]   ;;  %s4577_s1 = inlined_call_operand.hbm [shape: bf16[16,128], index: 1, kind: input, shape index: {}]   ;;  %s4578_s2 = inlined_call_operand.hbm [shape: bf16[768,512], index: 2, kind: input, shape index: {}]   ;;  %s4579_s3 = inlined_call_operand.vmem [shape: f32[1,512], index: 3, kind: input, shape index: {}]   ;;  %s4580_s4 = inlined_call_operand.hbm [shape: bf16[128,512], index: 4, kind: input, shape index: {}]   ;;  %s4581_s5 = inlined_call_operand.vmem [shape: f32[1,512], index: 5, kind: input, shape index: {}]   ;;  %s4582_s6 = inlined_call_operand.hbm [shape: bf16[512,256], index: 6, kind: input, shape index: {}]   ;;  %s4583_s7 = inlined_call_operand.hbm [shape: bf16[512,256], index: 7, kind: input, shape index: {}]   ;;  %s4584_s8 = inlined_call_operand.vmem [shape: f32[1,256], index: 8, kind: input, shape index: {}]   ;;  %s4585_s9 = inlined_call_operand.hbm [shape: bf16[256,128], index: 9, kind: input, shape index: {}]   ;;  %s4586_s10 = inlined_call_operand.vmem [shape: f32[1,128], index: 10, kind: input, shape index: {}]   ;;  %s4587_s11 = inlined_call_operand.hbm [shape: f32[16,128], index: 11, kind: output, shape index: {}]  }
   0x1   :  { %17 = vsyncpa [#allocation6], 0 }
   0x2   :  { %18 = vsyncpa [#allocation9], 0 }
   0x3   :  { %19 = vsyncpa [#allocation12], 0 }
   0x4   :  { %20 = vsyncpa [#allocation4], 0  ;;  %s4288_s17 = smov [#allocation5]   ;;  %s4102_s21 = scalar_lea.hbm %s4577_s1, 128 }
   0x5   :  { %s38_s18 = sshll.u32 %s4288_s17, 4  ;;  %p4103_p0 = scmp.ne.s32.totalorder %s4577_s1, %s4102_s21  ;;  %s39_s18 = int_to_ptr.vmem [resolvable:$true] %s38_s18 }
   0x6   :  { %p4106_p1 = scmp.lt.u32.totalorder %s4102_s21, %s4577_s1 }
   0x8   :  { %p4108_p2 = pnand %p4106_p1, %p4103_p0 }
   0xa   :  { %4111 = shalt.err (!%p4108_p2)
}
   0xb   :  { %s4112_s26 = scalar_lea.vmem %s39_s18, 128  ;;  %p4117_p4 = scmp.lt.s32.totalorder %s39_s18, %s39_s18 }
   0xc   :  { %p4113_p3 = scmp.ne.s32.totalorder %s39_s18, %s4112_s26  ;;  %p4118_p5 = scmp.lt.s32.totalorder %s4112_s26, %s4112_s26 }
   0xe   :  { %p4119_p6 = por %p4118_p5, %p4117_p4 }
  0x10   :  { %p4120_p7 = pnand %p4119_p6, %p4113_p3 }
  0x12   :  { %4123 = shalt.err (!%p4120_p7)
}
  0x13   :  { %s4289_s27 = smov 64   ;;  %s4290_s28 = smov 4  }
  0x14   :  { %44 = dma.hbm_to_vmem [thread:$0]  %s4577_s1, 128, %s39_s18, [#allocation6], %s4289_s27, %s4289_s27, %s4290_s28  }
  0x15   :  { %s4291_s12 = smov [#allocation8]   ;;  %s4124_s16 = scalar_lea.hbm %s4580_s4, 4096 }
  0x16   :  { %s64_s13 = sshll.u32 %s4291_s12, 4  ;;  %p4125_p8 = scmp.ne.s32.totalorder %s4580_s4, %s4124_s16  ;;  %s65_s13 = int_to_ptr.vmem [resolvable:$true] %s64_s13 }
  0x17   :  { %p4128_p9 = scmp.lt.u32.totalorder %s4124_s16, %s4580_s4 }
  0x19   :  { %p4130_p10 = pnand %p4128_p9, %p4125_p8 }
  0x1b   :  { %4133 = shalt.err (!%p4130_p10)
}
  0x1c   :  { %s4134_s22 = scalar_lea.vmem %s65_s13, 4096  ;;  %p4139_p12 = scmp.lt.s32.totalorder %s65_s13, %s65_s13 }
  0x1d   :  { %p4135_p11 = scmp.ne.s32.totalorder %s65_s13, %s4134_s22  ;;  %p4140_p13 = scmp.lt.s32.totalorder %s4134_s22, %s4134_s22 }
  0x1f   :  { %p4141_p0 = por %p4140_p13, %p4139_p12 }
  0x21   :  { %p4142_p1 = pnand %p4141_p0, %p4135_p11 }
  0x23   :  { %4145 = shalt.err (!%p4142_p1)
}
  0x24   :  { %s4292_s1 = smov 256   ;;  %s4293_s18 = smov 16  }
  0x25   :  { %70 = dma.hbm_to_vmem [thread:$0]  %s4580_s4, 4096, %s65_s13, [#allocation9], %s4292_s1, %s4292_s1, %s4293_s18  }
  0x26   :  { %s4294_s25 = smov [#allocation11]   ;;  %s4295_s29 = smov [#allocation2]  }
  0x27   :  { %s90_s26 = sshll.u32 %s4294_s25, 4  ;;  %s26_s30 = sshll.u32 %s4295_s29, 4  ;;  %s91_s26 = int_to_ptr.vmem [resolvable:$true] %s90_s26  ;;  %s4395_s30 = int_to_ptr.vmem [resolvable:$true] %s26_s30 }
  0x28   :  { %s4146_s15 = scalar_lea.hbm %s4583_s7, 8192 }
  0x29   :  { %p4147_p2 = scmp.ne.s32.totalorder %s4583_s7, %s4146_s15  ;;  %p4150_p3 = scmp.lt.u32.totalorder %s4146_s15, %s4583_s7 }
  0x2b   :  { %p4152_p4 = pnand %p4150_p3, %p4147_p2 }
  0x2d   :  { %4155 = shalt.err (!%p4152_p4)
}
  0x2e   :  { %s4156_s4 = scalar_lea.vmem %s91_s26, 8192  ;;  %p4161_p6 = scmp.lt.s32.totalorder %s91_s26, %s91_s26 }
  0x2f   :  { %p4157_p5 = scmp.ne.s32.totalorder %s91_s26, %s4156_s4  ;;  %p4162_p7 = scmp.lt.s32.totalorder %s4156_s4, %s4156_s4 }
  0x31   :  { %p4163_p8 = por %p4162_p7, %p4161_p6 }
  0x33   :  { %p4164_p9 = pnand %p4163_p8, %p4157_p5 }
  0x35   :  { %4167 = shalt.err (!%p4164_p9)
}
  0x36   :  { %s4296_s13 = smov 128   ;;  %s4297_s21 = smov 8  }
  0x37   :  { %96 = dma.hbm_to_vmem [thread:$0]  %s4583_s7, 8192, %s91_s26, [#allocation12], %s4296_s13, %s4296_s13, %s4297_s21  }
  0x38   :  { %s4168_s29 = scalar_lea.hbm %s4576_s0, 768 }
  0x39   :  { %p4169_p10 = scmp.ne.s32.totalorder %s4576_s0, %s4168_s29  ;;  %p4172_p11 = scmp.lt.u32.totalorder %s4168_s29, %s4576_s0 }
  0x3b   :  { %p4174_p12 = pnand %p4172_p11, %p4169_p10 }
  0x3d   :  { %4177 = shalt.err (!%p4174_p12)
}
  0x3e   :  { %s4178_s17 = scalar_lea.vmem %s4395_s30, 768  ;;  %p4183_p0 = scmp.lt.s32.totalorder %s4395_s30, %s4395_s30 }
  0x3f   :  { %p4179_p13 = scmp.ne.s32.totalorder %s4395_s30, %s4178_s17  ;;  %p4184_p1 = scmp.lt.s32.totalorder %s4178_s17, %s4178_s17 }
  0x41   :  { %p4185_p2 = por %p4184_p1, %p4183_p0 }
  0x43   :  { %p4186_p3 = pnand %p4185_p2, %p4179_p13 }
  0x45   :  { %4189 = shalt.err (!%p4186_p3)
}
  0x46   :  { %s4298_s7 = smov 384   ;;  %s4299_s26 = smov 24  }
  0x47   :  { %32 = dma.hbm_to_vmem [thread:$0]  %s4576_s0, 768, %s4395_s30, [#allocation3], %s4298_s7, %s4298_s7, %s4299_s26  }
  0x48   :  { %s4300_s4 = smov [#allocation7]   ;;  %s4301_s23 = smov [#allocation10]  }
  0x49   :  { %s50_s22 = sshll.u32 %s4300_s4, 4  ;;  %s78_s24 = sshll.u32 %s4301_s23, 4  ;;  %s51_s22 = int_to_ptr.vmem [resolvable:$true] %s50_s22  ;;  %s4429_s24 = int_to_ptr.vmem [resolvable:$true] %s78_s24 }
  0x4a   :  { %s4190_s12 = scalar_lea.hbm %s4578_s2, 24576 }
  0x4b   :  { %p4191_p4 = scmp.ne.s32.totalorder %s4578_s2, %s4190_s12  ;;  %p4194_p5 = scmp.lt.u32.totalorder %s4190_s12, %s4578_s2 }
  0x4d   :  { %p4196_p6 = pnand %p4194_p5, %p4191_p4 }
  0x4f   :  { %4199 = shalt.err (!%p4196_p6)
}
  0x50   :  { %s4200_s0 = scalar_lea.vmem %s51_s22, 24576  ;;  %p4205_p8 = scmp.lt.s32.totalorder %s51_s22, %s51_s22 }
  0x51   :  { %p4201_p7 = scmp.ne.s32.totalorder %s51_s22, %s4200_s0  ;;  %p4206_p9 = scmp.lt.s32.totalorder %s4200_s0, %s4200_s0 }
  0x53   :  { %p4207_p10 = por %p4206_p9, %p4205_p8 }
  0x55   :  { %p4208_p11 = pnand %p4207_p10, %p4201_p7 }
  0x57   :  { %4211 = shalt.err (!%p4208_p11)
}
  0x58   :  { %56 = dma.hbm_to_vmem [thread:$0]  %s4578_s2, 24576, %s51_s22, [#allocation6], %s4292_s1, %s4292_s1, %s4293_s18  }
  0x59   :  { %s4212_s20 = scalar_lea.hbm %s4582_s6, 8192 }
  0x5a   :  { %p4213_p12 = scmp.ne.s32.totalorder %s4582_s6, %s4212_s20  ;;  %p4216_p13 = scmp.lt.u32.totalorder %s4212_s20, %s4582_s6 }
  0x5c   :  { %p4218_p0 = pnand %p4216_p13, %p4213_p12 }
  0x5e   :  { %4221 = shalt.err (!%p4218_p0)
}
  0x5f   :  { %s4222_s12 = scalar_lea.vmem %s4429_s24, 8192  ;;  %p4227_p2 = scmp.lt.s32.totalorder %s4429_s24, %s4429_s24 }
  0x60   :  { %p4223_p1 = scmp.ne.s32.totalorder %s4429_s24, %s4222_s12  ;;  %p4228_p3 = scmp.lt.s32.totalorder %s4222_s12, %s4222_s12 }
  0x62   :  { %p4229_p4 = por %p4228_p3, %p4227_p2 }
  0x64   :  { %p4230_p5 = pnand %p4229_p4, %p4223_p1 }
  0x66   :  { %4233 = shalt.err (!%p4230_p5)
}
  0x67   :  { %84 = dma.hbm_to_vmem [thread:$0]  %s4582_s6, 8192, %s4429_s24, [#allocation9], %s4296_s13, %s4296_s13, %s4297_s21  }
  0x68   :  { %s4302_s18 = smov [#allocation13]   ;;  %s4234_s16 = scalar_lea.hbm %s4585_s9, 2048 }
  0x69   :  { %s104_s22 = sshll.u32 %s4302_s18, 4  ;;  %p4235_p6 = scmp.ne.s32.totalorder %s4585_s9, %s4234_s16  ;;  %s105_s22 = int_to_ptr.vmem [resolvable:$true] %s104_s22 }
  0x6a   :  { %p4238_p7 = scmp.lt.u32.totalorder %s4234_s16, %s4585_s9 }
  0x6c   :  { %p4240_p8 = pnand %p4238_p7, %p4235_p6 }
  0x6e   :  { %4243 = shalt.err (!%p4240_p8)
}
  0x6f   :  { %s4244_s26 = scalar_lea.vmem %s105_s22, 2048  ;;  %p4249_p10 = scmp.lt.s32.totalorder %s105_s22, %s105_s22 }
  0x70   :  { %p4245_p9 = scmp.ne.s32.totalorder %s105_s22, %s4244_s26  ;;  %p4250_p11 = scmp.lt.s32.totalorder %s4244_s26, %s4244_s26 }
  0x72   :  { %p4251_p12 = por %p4250_p11, %p4249_p10 }
  0x74   :  { %p4252_p13 = pnand %p4251_p12, %p4245_p9 }
  0x76   :  { %4255 = shalt.err (!%p4252_p13)
}
  0x77   :  { %110 = dma.hbm_to_vmem [thread:$0]  %s4585_s9, 2048, %s105_s22, [#allocation12], %s4289_s27, %s4289_s27, %s4290_s28  }
  0x78   :  { %4278 = dma.done.wait [#allocation3], 768  }
  0x79   :  { %4279 = vsyncadd [#allocation3], 4294966528 }
  0x7a   :  { %4280 = dma.done.wait [#allocation6], 24704  }
  0x7b   :  { %4281 = vsyncadd [#allocation6], 4294942592 }
  0x7c   :  { %4282 = dma.done.wait [#allocation9], 12288  }
  0x7d   :  { %4283 = vsyncadd [#allocation9], 4294955008 }
  0x7e   :  { %4284 = dma.done.wait [#allocation12], 10240  }
  0x7f   :  { %4285 = vsyncadd [#allocation12], 4294957056  ;;  %v3546_v0 = vld [vmem:[#allocation7 + $0x4] ss:$16 sps:$4 sm:$0xff]   ;;  %v3548_v1 = vld [vmem:[#allocation7] ss:$16 sps:$4 sm:$0xff]  }
  0x80   :  { %1345 = vmatprep.subr.bf16.mxu1 %v3546_v0  ;;  %v3549_v2 = vld [vmem:[#allocation7 + $0x24] ss:$16 sps:$4 sm:$0xff]   ;;  %v3551_v3 = vld [vmem:[#allocation7 + $0x20] ss:$16 sps:$4 sm:$0xff]   ;;  %s4304_s4 = smov [#allocation14]  }
  0x81   :  { %1346 = vmatpush1.bf16.msra.mxu1 %v3548_v1  ;;  %v3552_v4 = vld [vmem:[#allocation7 + $0x44] ss:$16 sps:$4 sm:$0xff]   ;;  %v3554_v5 = vld [vmem:[#allocation7 + $0x40] ss:$16 sps:$4 sm:$0xff]   ;;  %s3080_s23 = sshll.u32 %s4304_s4, 4  ;;  %s3081_s23 = int_to_ptr.vmem [resolvable:$true] %s3080_s23 }
  0x82   :  { %1347 = vmatprep.subr.bf16.mxu1 %v3549_v2  ;;  %v3555_v6 = vld [vmem:[#allocation7 + $0x64] ss:$16 sps:$4 sm:$0xff]   ;;  %v3557_v7 = vld [vmem:[#allocation7 + $0x60] ss:$16 sps:$4 sm:$0xff]   ;;  %s4256_s25 = scalar_lea.vmem %s3081_s23, 256  ;;  %p4261_p1 = scmp.lt.s32.totalorder %s3081_s23, %s3081_s23 }
  0x83   :  { %v3558_v8 = vld [vmem:[#allocation7 + $0x84] ss:$16 sps:$4 sm:$0xff]   ;;  %v3560_v9 = vld [vmem:[#allocation7 + $0x80] ss:$16 sps:$4 sm:$0xff]   ;;  %p4257_p0 = scmp.ne.s32.totalorder %s3081_s23, %s4256_s25  ;;  %p4262_p2 = scmp.lt.s32.totalorder %s4256_s25, %s4256_s25 }
  0x84   :  { %v3561_v10 = vld [vmem:[#allocation7 + $0xa4] ss:$16 sps:$4 sm:$0xff]   ;;  %v3563_v11 = vld [vmem:[#allocation7 + $0xa0] ss:$16 sps:$4 sm:$0xff]  }
  0x85   :  { %1348 = vmatpush1.bf16.msra.mxu1 %v3551_v3  ;;  %v3564_v12 = vld [vmem:[#allocation7 + $0xc4] ss:$16 sps:$4 sm:$0xff]   ;;  %v3566_v14 = vld [vmem:[#allocation7 + $0xc0] ss:$16 sps:$4 sm:$0xff]   ;;  %p4263_p3 = por %p4262_p2, %p4261_p1 }
  0x86   :  { %1349 = vmatprep.subr.bf16.mxu1 %v3552_v4  ;;  %v4481_v13 = vld [vmem:[#allocation2 + $0x4] ss:$24 sps:$4 sm:$0xff]   ;;  %v3602_v17 = vld [vmem:[#allocation7 + $0x400] ss:$16 sps:$4 sm:$0xff]   ;;  %v3701_v1 = vld [vmem:[#allocation2 + $0x14] ss:$24 sps:$4 sm:$0xff]  }
  0x87   :  { %v3567_v15 = vld [vmem:[#allocation7 + $0xe4] ss:$16 sps:$4 sm:$0xff]   ;;  %1377 = vmatprep.mubr.bf16.mxu1 %v4481_v13  ;;  %v3569_v18 = vld [vmem:[#allocation7 + $0xe0] ss:$16 sps:$4 sm:$0xff]   ;;  %1463 = vmatprep.mubr.bf16.mxu0 %v3701_v1  ;;  %p4264_p4 = pnand %p4263_p3, %p4257_p0 }
  0x88   :  { %v3600_v16 = vld [vmem:[#allocation7 + $0x404] ss:$16 sps:$4 sm:$0xff]   ;;  %v3608_v20 = vld [vmem:[#allocation7 + $0x420] ss:$16 sps:$4 sm:$0xff]  }
  0x89   :  { %1350 = vmatpush1.bf16.msra.mxu1 %v3554_v5  ;;  %1431 = vmatprep.subr.bf16.mxu0 %v3600_v16  ;;  %v3606_v19 = vld [vmem:[#allocation7 + $0x424] ss:$16 sps:$4 sm:$0xff]   ;;  %v3572_v22 = vld [vmem:[#allocation7 + $0x100] ss:$16 sps:$4 sm:$0xff]  }
  0x8a   :  { %1351 = vmatprep.subr.bf16.mxu1 %v3555_v6  ;;  %1432 = vmatpush1.bf16.msra.mxu0 %v3602_v17  ;;  %v3570_v21 = vld [vmem:[#allocation7 + $0x104] ss:$16 sps:$4 sm:$0xff]   ;;  %v3614_v25 = vld [vmem:[#allocation7 + $0x440] ss:$16 sps:$4 sm:$0xff]  }
  0x8b   :  { %1433 = vmatprep.subr.bf16.mxu0 %v3606_v19  ;;  %v3612_v23 = vld [vmem:[#allocation7 + $0x444] ss:$16 sps:$4 sm:$0xff]   ;;  %v3575_v27 = vld [vmem:[#allocation7 + $0x120] ss:$16 sps:$4 sm:$0xff]  }
  0x8c   :  { %v3573_v24 = vld [vmem:[#allocation7 + $0x124] ss:$16 sps:$4 sm:$0xff]   ;;  %v3620_v29 = vld [vmem:[#allocation7 + $0x460] ss:$16 sps:$4 sm:$0xff]  }
  0x8d   :  { %1352 = vmatpush1.bf16.msra.mxu1 %v3557_v7  ;;  %v3618_v26 = vld [vmem:[#allocation7 + $0x464] ss:$16 sps:$4 sm:$0xff]   ;;  %v3578_v31 = vld [vmem:[#allocation7 + $0x140] ss:$16 sps:$4 sm:$0xff]  }
  0x8e   :  { %1353 = vmatprep.subr.bf16.mxu1 %v3558_v8  ;;  %1434 = vmatpush1.bf16.msra.mxu0 %v3608_v20  ;;  %v3576_v28 = vld [vmem:[#allocation7 + $0x144] ss:$16 sps:$4 sm:$0xff]   ;;  %v3626_v33 = vld [vmem:[#allocation7 + $0x480] ss:$16 sps:$4 sm:$0xff]  }
  0x8f   :  { %1435 = vmatprep.subr.bf16.mxu0 %v3612_v23  ;;  %v3624_v30 = vld [vmem:[#allocation7 + $0x484] ss:$16 sps:$4 sm:$0xff]   ;;  %v3581_v35 = vld [vmem:[#allocation7 + $0x160] ss:$16 sps:$4 sm:$0xff]  }
  0x90   :  { %v3579_v32 = vld [vmem:[#allocation7 + $0x164] ss:$16 sps:$4 sm:$0xff]   ;;  %v3632_v37 = vld [vmem:[#allocation7 + $0x4a0] ss:$16 sps:$4 sm:$0xff]  }
  0x91   :  { %1354 = vmatpush1.bf16.msra.mxu1 %v3560_v9  ;;  %v3630_v34 = vld [vmem:[#allocation7 + $0x4a4] ss:$16 sps:$4 sm:$0xff]   ;;  %v3584_v39 = vld [vmem:[#allocation7 + $0x180] ss:$16 sps:$4 sm:$0xff]  }
  0x92   :  { %1355 = vmatprep.subr.bf16.mxu1 %v3561_v10  ;;  %1436 = vmatpush1.bf16.msra.mxu0 %v3614_v25  ;;  %v3582_v36 = vld [vmem:[#allocation7 + $0x184] ss:$16 sps:$4 sm:$0xff]   ;;  %v3638_v41 = vld [vmem:[#allocation7 + $0x4c0] ss:$16 sps:$4 sm:$0xff]  }
  0x93   :  { %1437 = vmatprep.subr.bf16.mxu0 %v3618_v26  ;;  %v3636_v38 = vld [vmem:[#allocation7 + $0x4c4] ss:$16 sps:$4 sm:$0xff]   ;;  %v3587_v43 = vld [vmem:[#allocation7 + $0x1a0] ss:$16 sps:$4 sm:$0xff]  }
  0x94   :  { %v3585_v40 = vld [vmem:[#allocation7 + $0x1a4] ss:$16 sps:$4 sm:$0xff]   ;;  %v3644_v45 = vld [vmem:[#allocation7 + $0x4e0] ss:$16 sps:$4 sm:$0xff]  }
  0x95   :  { %1356 = vmatpush1.bf16.msra.mxu1 %v3563_v11  ;;  %v3642_v42 = vld [vmem:[#allocation7 + $0x4e4] ss:$16 sps:$4 sm:$0xff]   ;;  %v3590_v47 = vld [vmem:[#allocation7 + $0x1c0] ss:$16 sps:$4 sm:$0xff]  }
  0x96   :  { %1357 = vmatprep.subr.bf16.mxu1 %v3564_v12  ;;  %1438 = vmatpush1.bf16.msra.mxu0 %v3620_v29  ;;  %v3588_v44 = vld [vmem:[#allocation7 + $0x1c4] ss:$16 sps:$4 sm:$0xff]   ;;  %v3650_v49 = vld [vmem:[#allocation7 + $0x500] ss:$16 sps:$4 sm:$0xff]  }
  0x97   :  { %1439 = vmatprep.subr.bf16.mxu0 %v3624_v30  ;;  %v3648_v46 = vld [vmem:[#allocation7 + $0x504] ss:$16 sps:$4 sm:$0xff]   ;;  %v3593_v51 = vld [vmem:[#allocation7 + $0x1e0] ss:$16 sps:$4 sm:$0xff]  }
  0x98   :  { %v3591_v48 = vld [vmem:[#allocation7 + $0x1e4] ss:$16 sps:$4 sm:$0xff]   ;;  %v3656_v53 = vld [vmem:[#allocation7 + $0x520] ss:$16 sps:$4 sm:$0xff]  }
  0x99   :  { %1358 = vmatpush1.bf16.msra.mxu1 %v3566_v14  ;;  %v3654_v50 = vld [vmem:[#allocation7 + $0x524] ss:$16 sps:$4 sm:$0xff]   ;;  %v4484_v55 = vld [vmem:[#allocation2] ss:$24 sps:$4 sm:$0xff]  }
  0x9a   :  { %1359 = vmatprep.subr.bf16.mxu1 %v3567_v15  ;;  %1440 = vmatpush1.bf16.msra.mxu0 %v3626_v33  ;;  %v3599_v52 = vld [vmem:[#allocation7 + $0x204] ss:$16 sps:$4 sm:$0xff]   ;;  %v3597_v56 = vld [vmem:[#allocation7 + $0x200] ss:$16 sps:$4 sm:$0xff]  }
  0x9b   :  { %1441 = vmatprep.subr.bf16.mxu0 %v3630_v34  ;;  %v3660_v54 = vld [vmem:[#allocation7 + $0x544] ss:$16 sps:$4 sm:$0xff]   ;;  %v3662_v58 = vld [vmem:[#allocation7 + $0x540] ss:$16 sps:$4 sm:$0xff]  }
  0x9c   :  { %v3605_v57 = vld [vmem:[#allocation7 + $0x224] ss:$16 sps:$4 sm:$0xff]   ;;  %v3603_v60 = vld [vmem:[#allocation7 + $0x220] ss:$16 sps:$4 sm:$0xff]  }
  0x9d   :  { %1360 = vmatpush1.bf16.msra.mxu1 %v3569_v18  ;;  %v3666_v59 = vld [vmem:[#allocation7 + $0x564] ss:$16 sps:$4 sm:$0xff]   ;;  %v3668_v63 = vld [vmem:[#allocation7 + $0x560] ss:$16 sps:$4 sm:$0xff]  }
  0x9e   :  { %1361 = vmatprep.subr.bf16.mxu1 %v3570_v21  ;;  %1442 = vmatpush1.bf16.msra.mxu0 %v3632_v37  ;;  %v4487_v61 = vld [vmem:[#allocation2 + $0xc] ss:$24 sps:$4 sm:$0xff]   ;;  %v3609_v2 = vld [vmem:[#allocation7 + $0x240] ss:$16 sps:$4 sm:$0xff]  }
  0x9f   :  { %1443 = vmatprep.subr.bf16.mxu0 %v3636_v38  ;;  %v3611_v62 = vld [vmem:[#allocation7 + $0x244] ss:$16 sps:$4 sm:$0xff]   ;;  %v3674_v4 = vld [vmem:[#allocation7 + $0x580] ss:$16 sps:$4 sm:$0xff]   ;;  %v3698_v38 = vld [vmem:[#allocation7 + $0xc] ss:$16 sps:$4 sm:$0xff]  }
  0xa0   :  { %v3672_v0 = vld [vmem:[#allocation7 + $0x584] ss:$16 sps:$4 sm:$0xff]   ;;  %v3615_v6 = vld [vmem:[#allocation7 + $0x260] ss:$16 sps:$4 sm:$0xff]  }
  0xa1   :  { %1362 = vmatpush1.bf16.msra.mxu1 %v3572_v22  ;;  %v3617_v3 = vld [vmem:[#allocation7 + $0x264] ss:$16 sps:$4 sm:$0xff]   ;;  %v3680_v8 = vld [vmem:[#allocation7 + $0x5a0] ss:$16 sps:$4 sm:$0xff]  }
  0xa2   :  { %1363 = vmatprep.subr.bf16.mxu1 %v3573_v24  ;;  %1444 = vmatpush1.bf16.msra.mxu0 %v3638_v41  ;;  %v3678_v5 = vld [vmem:[#allocation7 + $0x5a4] ss:$16 sps:$4 sm:$0xff]   ;;  %v3621_v10 = vld [vmem:[#allocation7 + $0x280] ss:$16 sps:$4 sm:$0xff]  }
  0xa3   :  { %1445 = vmatprep.subr.bf16.mxu0 %v3642_v42  ;;  %v3623_v7 = vld [vmem:[#allocation7 + $0x284] ss:$16 sps:$4 sm:$0xff]   ;;  %v3686_v12 = vld [vmem:[#allocation7 + $0x5c0] ss:$16 sps:$4 sm:$0xff]   ;;  %v3696_v42 = vld [vmem:[#allocation7 + $0x8] ss:$16 sps:$4 sm:$0xff]  }
  0xa4   :  { %v3684_v9 = vld [vmem:[#allocation7 + $0x5c4] ss:$16 sps:$4 sm:$0xff]   ;;  %v3627_v15 = vld [vmem:[#allocation7 + $0x2a0] ss:$16 sps:$4 sm:$0xff]  }
  0xa5   :  { %1364 = vmatpush1.bf16.msra.mxu1 %v3575_v27  ;;  %v3629_v11 = vld [vmem:[#allocation7 + $0x2a4] ss:$16 sps:$4 sm:$0xff]   ;;  %v3695_v16 = vld [vmem:[#allocation7 + $0x5e0] ss:$16 sps:$4 sm:$0xff]  }
  0xa6   :  { %1365 = vmatprep.subr.bf16.mxu1 %v3576_v28  ;;  %1446 = vmatpush1.bf16.msra.mxu0 %v3644_v45  ;;  %v3690_v14 = vld [vmem:[#allocation7 + $0x5e4] ss:$16 sps:$4 sm:$0xff]   ;;  %v3699_v18 = vld [vmem:[#allocation2 + $0x10] ss:$24 sps:$4 sm:$0xff]  }
  0xa7   :  { %1447 = vmatprep.subr.bf16.mxu0 %v3648_v46  ;;  %v3635_v17 = vld [vmem:[#allocation7 + $0x2c4] ss:$16 sps:$4 sm:$0xff]   ;;  %v3633_v19 = vld [vmem:[#allocation7 + $0x2c0] ss:$16 sps:$4 sm:$0xff]   ;;  %v3702_v46 = vld [vmem:[#allocation7 + $0x28] ss:$16 sps:$4 sm:$0xff]  }
  0xa8   :  { %v3641_v20 = vld [vmem:[#allocation7 + $0x2e4] ss:$16 sps:$4 sm:$0xff]   ;;  %v3639_v21 = vld [vmem:[#allocation7 + $0x2e0] ss:$16 sps:$4 sm:$0xff]  }
  0xa9   :  { %1366 = vmatpush1.bf16.msra.mxu1 %v3578_v31  ;;  %v3647_v22 = vld [vmem:[#allocation7 + $0x304] ss:$16 sps:$4 sm:$0xff]   ;;  %v3645_v23 = vld [vmem:[#allocation7 + $0x300] ss:$16 sps:$4 sm:$0xff]  }
  0xaa   :  { %1367 = vmatprep.subr.bf16.mxu1 %v3579_v32  ;;  %1448 = vmatpush1.bf16.msra.mxu0 %v3650_v49  ;;  %v3653_v24 = vld [vmem:[#allocation7 + $0x324] ss:$16 sps:$4 sm:$0xff]   ;;  %v3651_v25 = vld [vmem:[#allocation7 + $0x320] ss:$16 sps:$4 sm:$0xff]  }
  0xab   :  { %1449 = vmatprep.subr.bf16.mxu0 %v3654_v50  ;;  %v3659_v26 = vld [vmem:[#allocation7 + $0x344] ss:$16 sps:$4 sm:$0xff]   ;;  %v3657_v27 = vld [vmem:[#allocation7 + $0x340] ss:$16 sps:$4 sm:$0xff]   ;;  %v3705_v50 = vld [vmem:[#allocation7 + $0x48] ss:$16 sps:$4 sm:$0xff]  }
  0xac   :  { %v3665_v28 = vld [vmem:[#allocation7 + $0x364] ss:$16 sps:$4 sm:$0xff]   ;;  %v3663_v29 = vld [vmem:[#allocation7 + $0x360] ss:$16 sps:$4 sm:$0xff]  }
  0xad   :  { %1368 = vmatpush1.bf16.msra.mxu1 %v3581_v35  ;;  %v3671_v30 = vld [vmem:[#allocation7 + $0x384] ss:$16 sps:$4 sm:$0xff]   ;;  %v3669_v31 = vld [vmem:[#allocation7 + $0x380] ss:$16 sps:$4 sm:$0xff]  }
  0xae   :  { %1369 = vmatprep.subr.bf16.mxu1 %v3582_v36  ;;  %1450 = vmatpush1.bf16.msra.mxu0 %v3656_v53  ;;  %v3677_v32 = vld [vmem:[#allocation7 + $0x3a4] ss:$16 sps:$4 sm:$0xff]   ;;  %v3675_v33 = vld [vmem:[#allocation7 + $0x3a0] ss:$16 sps:$4 sm:$0xff]  }
  0xaf   :  { %1451 = vmatprep.subr.bf16.mxu0 %v3660_v54  ;;  %v3683_v34 = vld [vmem:[#allocation7 + $0x3c4] ss:$16 sps:$4 sm:$0xff]   ;;  %v3681_v35 = vld [vmem:[#allocation7 + $0x3c0] ss:$16 sps:$4 sm:$0xff]   ;;  %v3708_v54 = vld [vmem:[#allocation7 + $0x68] ss:$16 sps:$4 sm:$0xff]  }
  0xb0   :  { %v3689_v36 = vld [vmem:[#allocation7 + $0x3e4] ss:$16 sps:$4 sm:$0xff]   ;;  %v3687_v37 = vld [vmem:[#allocation7 + $0x3e0] ss:$16 sps:$4 sm:$0xff]  }
  0xb1   :  { %1370 = vmatpush1.bf16.msra.mxu1 %v3584_v39  ;;  %v4490_v39 = vld [vmem:[#allocation2 + $0x8] ss:$24 sps:$4 sm:$0xff]   ;;  %v3797_v41 = vld [vmem:[#allocation8 + $0x4] ss:$16 sps:$4 sm:$0xff]  }
  0xb2   :  { %1371 = vmatprep.subr.bf16.mxu1 %v3585_v40  ;;  %1452 = vmatpush1.bf16.msra.mxu0 %v3662_v58  ;;  %v3795_v40 = vld [vmem:[#allocation8] ss:$16 sps:$4 sm:$0xff]   ;;  %v3803_v45 = vld [vmem:[#allocation8 + $0x24] ss:$16 sps:$4 sm:$0xff]   ;;  %v3711_v58 = vld [vmem:[#allocation7 + $0x88] ss:$16 sps:$4 sm:$0xff]  }
  0xb3   :  { %1453 = vmatprep.subr.bf16.mxu0 %v3666_v59  ;;  %v3809_v49 = vld [vmem:[#allocation8 + $0x44] ss:$16 sps:$4 sm:$0xff]   ;;  %v3716_v59 = vld [vmem:[#allocation7 + $0xac] ss:$16 sps:$4 sm:$0xff]   ;;  %v3831_v1 = vld [vmem:[#allocation8 + $0xc0] ss:$16 sps:$4 sm:$0xff]  }
  0xb4   :  { %v3815_v53 = vld [vmem:[#allocation8 + $0x64] ss:$16 sps:$4 sm:$0xff]  }
  0xb5   :  { %1372 = vmatpush1.bf16.msra.mxu1 %v3587_v43  ;;  %v3704_v43 = vld [vmem:[#allocation7 + $0x2c] ss:$16 sps:$4 sm:$0xff]  }
  0xb6   :  { %1373 = vmatprep.subr.bf16.mxu1 %v3588_v44  ;;  %1454 = vmatpush1.bf16.msra.mxu0 %v3668_v63  ;;  %v3801_v44 = vld [vmem:[#allocation8 + $0x20] ss:$16 sps:$4 sm:$0xff]   ;;  %v3714_v63 = vld [vmem:[#allocation7 + $0xa8] ss:$16 sps:$4 sm:$0xff]  }
  0xb7   :  { %1455 = vmatprep.subr.bf16.mxu0 %v3672_v0  ;;  %v3719_v0 = vld [vmem:[#allocation7 + $0xcc] ss:$16 sps:$4 sm:$0xff]  }
  0xb9   :  { %1374 = vmatpush1.bf16.msra.mxu1 %v3590_v47  ;;  %v3707_v47 = vld [vmem:[#allocation7 + $0x4c] ss:$16 sps:$4 sm:$0xff]  }
  0xba   :  { %1375 = vmatprep.subr.bf16.mxu1 %v3591_v48  ;;  %1456 = vmatpush1.bf16.msra.mxu0 %v3674_v4  ;;  %v3807_v48 = vld [vmem:[#allocation8 + $0x40] ss:$16 sps:$4 sm:$0xff]   ;;  %v3722_v4 = vld [vmem:[#allocation7 + $0xec] ss:$16 sps:$4 sm:$0xff]  }
  0xbb   :  { %1457 = vmatprep.subr.bf16.mxu0 %v3678_v5  ;;  %v3837_v5 = vld [vmem:[#allocation8 + $0xe0] ss:$16 sps:$4 sm:$0xff]  }
  0xbd   :  { %1376 = vmatpush1.bf16.msra.mxu1 %v3593_v51  ;;  %v3710_v51 = vld [vmem:[#allocation7 + $0x6c] ss:$16 sps:$4 sm:$0xff]  }
  0xbe   :  { %1388 = vmatprep.subr.bf16.mxu1 %v3599_v52  ;;  %1458 = vmatpush1.bf16.msra.mxu0 %v3680_v8  ;;  %v3813_v52 = vld [vmem:[#allocation8 + $0x60] ss:$16 sps:$4 sm:$0xff]   ;;  %v3725_v8 = vld [vmem:[#allocation7 + $0x10c] ss:$16 sps:$4 sm:$0xff]  }
  0xbf   :  { %1459 = vmatprep.subr.bf16.mxu0 %v3684_v9  ;;  %v4494_v9 = vld [vmem:[#allocation5] sm:$0xff]  }
  0xc0   :  { %1378 = vmatmul.mubr.bf16.vlgmr.msra.gmra.mrb[0].mxu1 %v4484_v55 }
  0xc1   :  { %1389 = vmatpush1.bf16.msra.mxu1 %v3597_v56  ;;  %1420 = vmatprep.mubr.bf16.mxu1 %v4487_v61  ;;  %v3713_v56 = vld [vmem:[#allocation7 + $0x8c] ss:$16 sps:$4 sm:$0xff]  }
  0xc2   :  { %1390 = vmatprep.subr.bf16.mxu1 %v3605_v57  ;;  %1460 = vmatpush1.bf16.msra.mxu0 %v3686_v12  ;;  %v3819_v57 = vld [vmem:[#allocation8 + $0x80] ss:$16 sps:$4 sm:$0xff]   ;;  %v3728_v12 = vld [vmem:[#allocation7 + $0x12c] ss:$16 sps:$4 sm:$0xff]  }
  0xc3   :  { %1461 = vmatprep.subr.bf16.mxu0 %v3690_v14  ;;  %v3726_v14 = vld [vmem:[#allocation7 + $0x128] ss:$16 sps:$4 sm:$0xff]  }
  0xc5   :  { %1391 = vmatpush1.bf16.msra.mxu1 %v3603_v60  ;;  %v3825_v60 = vld [vmem:[#allocation8 + $0xa0] ss:$16 sps:$4 sm:$0xff]  }
  0xc6   :  { %1392 = vmatprep.subr.bf16.mxu1 %v3611_v62  ;;  %1462 = vmatpush1.bf16.msra.mxu0 %v3695_v16  ;;  %v3827_v62 = vld [vmem:[#allocation8 + $0xa4] ss:$16 sps:$4 sm:$0xff]   ;;  %v3729_v16 = vld [vmem:[#allocation7 + $0x148] ss:$16 sps:$4 sm:$0xff]  }
  0xc7   :  { %1825 = vmatprep.subr.bf16.mxu0 %v3797_v41  ;;  %v3768_v41 = vld [vmem:[#allocation7 + $0x2e8] ss:$16 sps:$4 sm:$0xff]  }
  0xc9   :  { %1393 = vmatpush1.bf16.msra.mxu1 %v3609_v2  ;;  %1464 = vmatmul.mubr.bf16.vlgmr.msra.gmra.mrb[0].mxu0 %v3699_v18  ;;  %v3833_v2 = vld [vmem:[#allocation8 + $0xc4] ss:$16 sps:$4 sm:$0xff]   ;;  %v3732_v18 = vld [vmem:[#allocation7 + $0x168] ss:$16 sps:$4 sm:$0xff]  }
  0xca   :  { %1394 = vmatprep.subr.bf16.mxu1 %v3617_v3  ;;  %1826 = vmatpush1.bf16.msra.mxu0 %v3795_v40  ;;  %v3717_v3 = vld [vmem:[#allocation7 + $0xc8] ss:$16 sps:$4 sm:$0xff]  }
  0xcb   :  { %1827 = vmatprep.subr.bf16.mxu0 %v3803_v45  ;;  %v3765_v40 = vld [vmem:[#allocation7 + $0x2c8] ss:$16 sps:$4 sm:$0xff]  }
  0xcc   :  { %v3892_v45 = vld [vmem:[#allocation11] ss:$8 sps:$4 sm:$0xff]  }
  0xcd   :  { %1395 = vmatpush1.bf16.msra.mxu1 %v3615_v6  ;;  %v3839_v6 = vld [vmem:[#allocation8 + $0xe4] ss:$16 sps:$4 sm:$0xff]  }
  0xce   :  { %1396 = vmatprep.subr.bf16.mxu1 %v3623_v7  ;;  %1828 = vmatpush1.bf16.msra.mxu0 %v3801_v44  ;;  %v3720_v7 = vld [vmem:[#allocation7 + $0xe8] ss:$16 sps:$4 sm:$0xff]   ;;  %v3776_v44 = vld [vmem:[#allocation7 + $0x32c] ss:$16 sps:$4 sm:$0xff]  }
  0xcf   :  { %1829 = vmatprep.subr.bf16.mxu0 %v3809_v49  ;;  %v3779_v49 = vld [vmem:[#allocation7 + $0x34c] ss:$16 sps:$4 sm:$0xff]  }
  0xd1   :  { %1397 = vmatpush1.bf16.msra.mxu1 %v3621_v10  ;;  %v4303_v10 = vmov 0  }
  0xd2   :  { %1398 = vmatprep.subr.bf16.mxu1 %v3629_v11  ;;  %1830 = vmatpush1.bf16.msra.mxu0 %v3807_v48  ;;  %v3723_v11 = vld [vmem:[#allocation7 + $0x108] ss:$16 sps:$4 sm:$0xff]   ;;  %v3897_v48 = vld [vmem:[#allocation11 + $0x14] ss:$8 sps:$4 sm:$0xff]  }
  0xd3   :  { %1831 = vmatprep.subr.bf16.mxu0 %v3815_v53  ;;  %1857 = vmatprep.mubr.bf16.mxu0 %v4303_v10  ;;  %v3782_v53 = vld [vmem:[#allocation7 + $0x36c] ss:$16 sps:$4 sm:$0xff]  }
  0xd5   :  { %1399 = vmatpush1.bf16.msra.mxu1 %v3627_v15  ;;  %v3731_v15 = vld [vmem:[#allocation7 + $0x14c] ss:$16 sps:$4 sm:$0xff]  }
  0xd6   :  { %1400 = vmatprep.subr.bf16.mxu1 %v3635_v17  ;;  %1832 = vmatpush1.bf16.msra.mxu0 %v3813_v52  ;;  %v3734_v17 = vld [vmem:[#allocation7 + $0x16c] ss:$16 sps:$4 sm:$0xff]   ;;  %v3777_v52 = vld [vmem:[#allocation7 + $0x348] ss:$16 sps:$4 sm:$0xff]  }
  0xd9   :  { %1401 = vmatpush1.bf16.msra.mxu1 %v3633_v19  ;;  %v3737_v19 = vld [vmem:[#allocation7 + $0x18c] ss:$16 sps:$4 sm:$0xff]  }
  0xda   :  { %1402 = vmatprep.subr.bf16.mxu1 %v3641_v20  ;;  %v3735_v20 = vld [vmem:[#allocation7 + $0x188] ss:$16 sps:$4 sm:$0xff]  }
  0xdd   :  { %1403 = vmatpush1.bf16.msra.mxu1 %v3639_v21  ;;  %v3740_v21 = vld [vmem:[#allocation7 + $0x1ac] ss:$16 sps:$4 sm:$0xff]  }
  0xde   :  { %1404 = vmatprep.subr.bf16.mxu1 %v3647_v22  ;;  %v3738_v22 = vld [vmem:[#allocation7 + $0x1a8] ss:$16 sps:$4 sm:$0xff]  }
  0xe1   :  { %1405 = vmatpush1.bf16.msra.mxu1 %v3645_v23  ;;  %v3743_v23 = vld [vmem:[#allocation7 + $0x1cc] ss:$16 sps:$4 sm:$0xff]  }
  0xe2   :  { %1406 = vmatprep.subr.bf16.mxu1 %v3653_v24  ;;  %v3741_v24 = vld [vmem:[#allocation7 + $0x1c8] ss:$16 sps:$4 sm:$0xff]  }
  0xe5   :  { %1407 = vmatpush1.bf16.msra.mxu1 %v3651_v25  ;;  %v3746_v25 = vld [vmem:[#allocation7 + $0x1ec] ss:$16 sps:$4 sm:$0xff]  }
  0xe6   :  { %1408 = vmatprep.subr.bf16.mxu1 %v3659_v26  ;;  %v3744_v26 = vld [vmem:[#allocation7 + $0x1e8] ss:$16 sps:$4 sm:$0xff]  }
  0xe9   :  { %1409 = vmatpush1.bf16.msra.mxu1 %v3657_v27  ;;  %v3749_v27 = vld [vmem:[#allocation7 + $0x20c] ss:$16 sps:$4 sm:$0xff]  }
  0xea   :  { %1410 = vmatprep.subr.bf16.mxu1 %v3665_v28  ;;  %v3747_v28 = vld [vmem:[#allocation7 + $0x208] ss:$16 sps:$4 sm:$0xff]  }
  0xed   :  { %1411 = vmatpush1.bf16.msra.mxu1 %v3663_v29  ;;  %v3752_v29 = vld [vmem:[#allocation7 + $0x22c] ss:$16 sps:$4 sm:$0xff]  }
  0xee   :  { %1412 = vmatprep.subr.bf16.mxu1 %v3671_v30  ;;  %v3750_v30 = vld [vmem:[#allocation7 + $0x228] ss:$16 sps:$4 sm:$0xff]  }
  0xf1   :  { %1413 = vmatpush1.bf16.msra.mxu1 %v3669_v31  ;;  %v3755_v31 = vld [vmem:[#allocation7 + $0x24c] ss:$16 sps:$4 sm:$0xff]  }
  0xf2   :  { %1414 = vmatprep.subr.bf16.mxu1 %v3677_v32  ;;  %v3753_v32 = vld [vmem:[#allocation7 + $0x248] ss:$16 sps:$4 sm:$0xff]  }
  0xf5   :  { %1415 = vmatpush1.bf16.msra.mxu1 %v3675_v33  ;;  %v3758_v33 = vld [vmem:[#allocation7 + $0x26c] ss:$16 sps:$4 sm:$0xff]  }
  0xf6   :  { %1416 = vmatprep.subr.bf16.mxu1 %v3683_v34  ;;  %v3756_v34 = vld [vmem:[#allocation7 + $0x268] ss:$16 sps:$4 sm:$0xff]  }
  0xf9   :  { %1417 = vmatpush1.bf16.msra.mxu1 %v3681_v35  ;;  %v3761_v35 = vld [vmem:[#allocation7 + $0x28c] ss:$16 sps:$4 sm:$0xff]  }
  0xfa   :  { %1418 = vmatprep.subr.bf16.mxu1 %v3689_v36  ;;  %v3759_v36 = vld [vmem:[#allocation7 + $0x288] ss:$16 sps:$4 sm:$0xff]  }
  0xfd   :  { %1419 = vmatpush1.bf16.msra.mxu1 %v3687_v37  ;;  %v3764_v37 = vld [vmem:[#allocation7 + $0x2ac] ss:$16 sps:$4 sm:$0xff]  }
  0xfe   :  { %1474 = vmatprep.subr.bf16.mxu1 %v3698_v38  ;;  %v3767_v38 = vld [vmem:[#allocation7 + $0x2cc] ss:$16 sps:$4 sm:$0xff]  }
 0x100   :  { %1421 = vmatmul.mubr.bf16.vlgmr.msra.gmra.mrb[0].mxu1 %v4490_v39 }
 0x101   :  { %1475 = vmatpush1.bf16.msra.mxu1 %v3696_v42  ;;  %1506 = vmatprep.mubr.bf16.mxu1 %v4481_v13  ;;  %v3821_v13 = vld [vmem:[#allocation8 + $0x84] ss:$16 sps:$4 sm:$0xff]   ;;  %v3773_v42 = vld [vmem:[#allocation7 + $0x30c] ss:$16 sps:$4 sm:$0xff]  }
 0x102   :  { %1476 = vmatprep.subr.bf16.mxu1 %v3704_v43  ;;  %1833 = vmatprep.subr.bf16.mxu0 %v3821_v13  ;;  %v3771_v43 = vld [vmem:[#allocation7 + $0x308] ss:$16 sps:$4 sm:$0xff]   ;;  %v3785_v13 = vld [vmem:[#allocation7 + $0x38c] ss:$16 sps:$4 sm:$0xff]  }
 0x103   :  { %1834 = vmatpush1.bf16.msra.mxu0 %v3819_v57  ;;  %v3780_v57 = vld [vmem:[#allocation7 + $0x368] ss:$16 sps:$4 sm:$0xff]  }
 0x104   :  { %1835 = vmatprep.subr.bf16.mxu0 %v3827_v62  ;;  %v3788_v62 = vld [vmem:[#allocation7 + $0x3ac] ss:$16 sps:$4 sm:$0xff]  }
 0x105   :  { %1477 = vmatpush1.bf16.msra.mxu1 %v3702_v46  ;;  %v3894_v46 = vld [vmem:[#allocation11 + $0x4] ss:$8 sps:$4 sm:$0xff]  }
 0x106   :  { %1478 = vmatprep.subr.bf16.mxu1 %v3707_v47  ;;  %v3774_v47 = vld [vmem:[#allocation7 + $0x328] ss:$16 sps:$4 sm:$0xff]  }
 0x107   :  { %1836 = vmatpush1.bf16.msra.mxu0 %v3825_v60  ;;  %v3783_v60 = vld [vmem:[#allocation7 + $0x388] ss:$16 sps:$4 sm:$0xff]  }
 0x108   :  { %1837 = vmatprep.subr.bf16.mxu0 %v3833_v2  ;;  %v3791_v2 = vld [vmem:[#allocation7 + $0x3cc] ss:$16 sps:$4 sm:$0xff]  }
 0x109   :  { %1479 = vmatpush1.bf16.msra.mxu1 %v3705_v50  ;;  %v3895_v50 = vld [vmem:[#allocation11 + $0x10] ss:$8 sps:$4 sm:$0xff]  }
 0x10a   :  { %1480 = vmatprep.subr.bf16.mxu1 %v3710_v51  ;;  %v3900_v51 = vld [vmem:[#allocation11 + $0x24] ss:$8 sps:$4 sm:$0xff]  }
 0x10b   :  { %1838 = vmatpush1.bf16.msra.mxu0 %v3831_v1  ;;  %v3786_v1 = vld [vmem:[#allocation7 + $0x3a8] ss:$16 sps:$4 sm:$0xff]  }
 0x10c   :  { %1839 = vmatprep.subr.bf16.mxu0 %v3839_v6  ;;  %v3794_v6 = vld [vmem:[#allocation7 + $0x3ec] ss:$16 sps:$4 sm:$0xff]  }
 0x10d   :  { %1481 = vmatpush1.bf16.msra.mxu1 %v3708_v54  ;;  %v3898_v54 = vld [vmem:[#allocation11 + $0x20] ss:$8 sps:$4 sm:$0xff]  }
 0x10e   :  { %1482 = vmatprep.subr.bf16.mxu1 %v3713_v56  ;;  %v3903_v56 = vld [vmem:[#allocation11 + $0x34] ss:$8 sps:$4 sm:$0xff]  }
 0x10f   :  { %1840 = vmatpush1.bf16.msra.mxu0 %v3837_v5  ;;  %v3789_v5 = vld [vmem:[#allocation7 + $0x3c8] ss:$16 sps:$4 sm:$0xff]  }
 0x110   :  { %2383 = vmatprep.subr.bf16.mxu0 %v3894_v46  ;;  %v3942_v46 = vld [vmem:[#allocation11 + $0x104] ss:$8 sps:$4 sm:$0xff]  }
 0x111   :  { %1483 = vmatpush1.bf16.msra.mxu1 %v3711_v58  ;;  %v3901_v58 = vld [vmem:[#allocation11 + $0x30] ss:$8 sps:$4 sm:$0xff]  }
 0x112   :  { %1484 = vmatprep.subr.bf16.mxu1 %v3716_v59  ;;  %1858 = vmatmul.mubr.bf16.vlgmr.msra.gmra.mrb[4].mxu0 %v4494_v9  ;;  %v3906_v59 = vld [vmem:[#allocation11 + $0x44] ss:$8 sps:$4 sm:$0xff]  }
 0x113   :  { %2384 = vmatpush1.bf16.msra.mxu0 %v3892_v45  ;;  %v3937_v45 = vld [vmem:[#allocation11 + $0xf0] ss:$8 sps:$4 sm:$0xff]  }
 0x114   :  { %2385 = vmatprep.subr.bf16.mxu0 %v3897_v48  ;;  %v3849_v48 = vld [vmem:[#allocation7 + $0x52c] ss:$16 sps:$4 sm:$0xff]  }
 0x115   :  { %1485 = vmatpush1.bf16.msra.mxu1 %v3714_v63  ;;  %v3904_v63 = vld [vmem:[#allocation11 + $0x40] ss:$8 sps:$4 sm:$0xff]  }
 0x116   :  { %1486 = vmatprep.subr.bf16.mxu1 %v3719_v0  ;;  %v3909_v0 = vld [vmem:[#allocation11 + $0x54] ss:$8 sps:$4 sm:$0xff]  }
 0x117   :  { %2386 = vmatpush1.bf16.msra.mxu0 %v3895_v50  ;;  %v3852_v50 = vld [vmem:[#allocation7 + $0x54c] ss:$16 sps:$4 sm:$0xff]  }
 0x118   :  { %2387 = vmatprep.subr.bf16.mxu0 %v3900_v51  ;;  %v3850_v51 = vld [vmem:[#allocation7 + $0x548] ss:$16 sps:$4 sm:$0xff]  }
 0x119   :  { %1487 = vmatpush1.bf16.msra.mxu1 %v3717_v3  ;;  %v3907_v3 = vld [vmem:[#allocation11 + $0x50] ss:$8 sps:$4 sm:$0xff]  }
 0x11a   :  { %1488 = vmatprep.subr.bf16.mxu1 %v3722_v4  ;;  %v3912_v4 = vld [vmem:[#allocation11 + $0x64] ss:$8 sps:$4 sm:$0xff]  }
 0x11b   :  { %2388 = vmatpush1.bf16.msra.mxu0 %v3898_v54  ;;  %v3858_v54 = vld [vmem:[#allocation7 + $0x58c] ss:$16 sps:$4 sm:$0xff]  }
 0x11c   :  { %2389 = vmatprep.subr.bf16.mxu0 %v3903_v56 }
 0x11d   :  { %1489 = vmatpush1.bf16.msra.mxu1 %v3720_v7  ;;  %v3910_v7 = vld [vmem:[#allocation11 + $0x60] ss:$8 sps:$4 sm:$0xff]  }
 0x11e   :  { %1490 = vmatprep.subr.bf16.mxu1 %v3725_v8  ;;  %v3915_v8 = vld [vmem:[#allocation11 + $0x74] ss:$8 sps:$4 sm:$0xff]  }
 0x11f   :  { %2390 = vmatpush1.bf16.msra.mxu0 %v3901_v58 }
 0x120   :  { %2391 = vmatprep.subr.bf16.mxu0 %v3906_v59  ;;  %v3861_v59 = vld [vmem:[#allocation7 + $0x5ac] ss:$16 sps:$4 sm:$0xff]  }
 0x121   :  { %1491 = vmatpush1.bf16.msra.mxu1 %v3723_v11  ;;  %v3792_v11 = vld [vmem:[#allocation7 + $0x3e8] ss:$16 sps:$4 sm:$0xff]  }
 0x122   :  { %1492 = vmatprep.subr.bf16.mxu1 %v3728_v12  ;;  %v3800_v12 = vld [vmem:[#allocation7 + $0x40c] ss:$16 sps:$4 sm:$0xff]  }
 0x123   :  { %2392 = vmatpush1.bf16.msra.mxu0 %v3904_v63  ;;  %v3864_v63 = vld [vmem:[#allocation7 + $0x5cc] ss:$16 sps:$4 sm:$0xff]  }
 0x124   :  { %2393 = vmatprep.subr.bf16.mxu0 %v3909_v0  ;;  %v3862_v0 = vld [vmem:[#allocation7 + $0x5c8] ss:$16 sps:$4 sm:$0xff]  }
 0x125   :  { %1493 = vmatpush1.bf16.msra.mxu1 %v3726_v14  ;;  %v3913_v14 = vld [vmem:[#allocation11 + $0x70] ss:$8 sps:$4 sm:$0xff]  }
 0x126   :  { %1494 = vmatprep.subr.bf16.mxu1 %v3731_v15  ;;  %v3918_v15 = vld [vmem:[#allocation11 + $0x84] ss:$8 sps:$4 sm:$0xff]  }
 0x127   :  { %2394 = vmatpush1.bf16.msra.mxu0 %v3907_v3  ;;  %v3870_v3 = vld [vmem:[#allocation8 + $0xc] ss:$16 sps:$4 sm:$0xff]  }
 0x128   :  { %2395 = vmatprep.subr.bf16.mxu0 %v3912_v4  ;;  %v3868_v4 = vld [vmem:[#allocation8 + $0x8] ss:$16 sps:$4 sm:$0xff]  }
 0x129   :  { %1495 = vmatpush1.bf16.msra.mxu1 %v3729_v16  ;;  %v3798_v16 = vld [vmem:[#allocation7 + $0x408] ss:$16 sps:$4 sm:$0xff]  }
 0x12a   :  { %1496 = vmatprep.subr.bf16.mxu1 %v3734_v17  ;;  %v3806_v17 = vld [vmem:[#allocation7 + $0x42c] ss:$16 sps:$4 sm:$0xff]  }
 0x12b   :  { %2396 = vmatpush1.bf16.msra.mxu0 %v3910_v7  ;;  %v3871_v7 = vld [vmem:[#allocation8 + $0x28] ss:$16 sps:$4 sm:$0xff]  }
 0x12c   :  { %2397 = vmatprep.subr.bf16.mxu0 %v3915_v8  ;;  %v3876_v8 = vld [vmem:[#allocation8 + $0x4c] ss:$16 sps:$4 sm:$0xff]  }
 0x12d   :  { %1497 = vmatpush1.bf16.msra.mxu1 %v3732_v18  ;;  %v3916_v18 = vld [vmem:[#allocation11 + $0x80] ss:$8 sps:$4 sm:$0xff]  }
 0x12e   :  { %1498 = vmatprep.subr.bf16.mxu1 %v3737_v19  ;;  %v3921_v19 = vld [vmem:[#allocation11 + $0x94] ss:$8 sps:$4 sm:$0xff]  }
 0x12f   :  { %2398 = vmatpush1.bf16.msra.mxu0 %v3913_v14  ;;  %v3879_v14 = vld [vmem:[#allocation8 + $0x6c] ss:$16 sps:$4 sm:$0xff]  }
 0x130   :  { %2399 = vmatprep.subr.bf16.mxu0 %v3918_v15 }
 0x131   :  { %1499 = vmatpush1.bf16.msra.mxu1 %v3735_v20  ;;  %v3804_v20 = vld [vmem:[#allocation7 + $0x428] ss:$16 sps:$4 sm:$0xff]  }
 0x132   :  { %1500 = vmatprep.subr.bf16.mxu1 %v3740_v21  ;;  %v4100_v21 = vld [vmem:[#allocation2 + $0x14] ss:$24 sps:$4 sm:$0xff]  }
 0x133   :  { %2400 = vmatpush1.bf16.msra.mxu0 %v3916_v18 }
 0x134   :  { %2401 = vmatprep.subr.bf16.mxu0 %v3921_v19  ;;  %v3880_v19 = vld [vmem:[#allocation8 + $0x88] ss:$16 sps:$4 sm:$0xff]  }
 0x135   :  { %1501 = vmatpush1.bf16.msra.mxu1 %v3738_v22  ;;  %v3812_v22 = vld [vmem:[#allocation7 + $0x44c] ss:$16 sps:$4 sm:$0xff]  }
 0x136   :  { %1502 = vmatprep.subr.bf16.mxu1 %v3743_v23  ;;  %v3919_v23 = vld [vmem:[#allocation11 + $0x90] ss:$8 sps:$4 sm:$0xff]  }
 0x137   :  { %2402 = vmatpush1.bf16.msra.mxu0 %v3919_v23 }
 0x139   :  { %1503 = vmatpush1.bf16.msra.mxu1 %v3741_v24  ;;  %v3924_v24 = vld [vmem:[#allocation11 + $0xa4] ss:$8 sps:$4 sm:$0xff]  }
 0x13a   :  { %1504 = vmatprep.subr.bf16.mxu1 %v3746_v25  ;;  %v3810_v25 = vld [vmem:[#allocation7 + $0x448] ss:$16 sps:$4 sm:$0xff]   ;;  %2403 = vmatprep.subr.bf16.mxu0 %v3924_v24 }
 0x13b   :  { %v3883_v24 = vld [vmem:[#allocation8 + $0xa8] ss:$16 sps:$4 sm:$0xff]  }
 0x13d   :  { %1505 = vmatpush1.bf16.msra.mxu1 %v3744_v26  ;;  %v3818_v26 = vld [vmem:[#allocation7 + $0x46c] ss:$16 sps:$4 sm:$0xff]  }
 0x13e   :  { %1517 = vmatprep.subr.bf16.mxu1 %v3749_v27  ;;  %v3922_v27 = vld [vmem:[#allocation11 + $0xa0] ss:$8 sps:$4 sm:$0xff]  }
 0x13f   :  { %2404 = vmatpush1.bf16.msra.mxu0 %v3922_v27 }
 0x140   :  { %1507 = vmatmul.mubr.bf16.vlgmr.msra.gmra.mrb[4].mxu1 %v4484_v55  ;;  %v3762_v55 = vld [vmem:[#allocation7 + $0x2a8] ss:$16 sps:$4 sm:$0xff]  }
 0x141   :  { %1518 = vmatpush1.bf16.msra.mxu1 %v3747_v28  ;;  %1549 = vmatprep.mubr.bf16.mxu1 %v4487_v61  ;;  %v3770_v61 = vld [vmem:[#allocation7 + $0x2ec] ss:$16 sps:$4 sm:$0xff]   ;;  %v3816_v28 = vld [vmem:[#allocation7 + $0x468] ss:$16 sps:$4 sm:$0xff]  }
 0x142   :  { %1519 = vmatprep.subr.bf16.mxu1 %v3752_v29  ;;  %v3824_v29 = vld [vmem:[#allocation7 + $0x48c] ss:$16 sps:$4 sm:$0xff]  }
 0x145   :  { %1520 = vmatpush1.bf16.msra.mxu1 %v3750_v30  ;;  %v3925_v30 = vld [vmem:[#allocation11 + $0xb0] ss:$8 sps:$4 sm:$0xff]  }
 0x146   :  { %1521 = vmatprep.subr.bf16.mxu1 %v3755_v31  ;;  %v3930_v31 = vld [vmem:[#allocation11 + $0xc4] ss:$8 sps:$4 sm:$0xff]  }
 0x149   :  { %1522 = vmatpush1.bf16.msra.mxu1 %v3753_v32  ;;  %v3822_v32 = vld [vmem:[#allocation7 + $0x488] ss:$16 sps:$4 sm:$0xff]  }
 0x14a   :  { %1523 = vmatprep.subr.bf16.mxu1 %v3758_v33  ;;  %v3830_v33 = vld [vmem:[#allocation7 + $0x4ac] ss:$16 sps:$4 sm:$0xff]  }
 0x14d   :  { %1524 = vmatpush1.bf16.msra.mxu1 %v3756_v34  ;;  %v3928_v34 = vld [vmem:[#allocation11 + $0xc0] ss:$8 sps:$4 sm:$0xff]  }
 0x14e   :  { %1525 = vmatprep.subr.bf16.mxu1 %v3761_v35  ;;  %v3933_v35 = vld [vmem:[#allocation11 + $0xd4] ss:$8 sps:$4 sm:$0xff]  }
 0x151   :  { %1526 = vmatpush1.bf16.msra.mxu1 %v3759_v36  ;;  %v3828_v36 = vld [vmem:[#allocation7 + $0x4a8] ss:$16 sps:$4 sm:$0xff]  }
 0x152   :  { %1527 = vmatprep.subr.bf16.mxu1 %v3764_v37  ;;  %v3836_v37 = vld [vmem:[#allocation7 + $0x4cc] ss:$16 sps:$4 sm:$0xff]  }
 0x155   :  { %1528 = vmatpush1.bf16.msra.mxu1 %v3762_v55  ;;  %v3931_v55 = vld [vmem:[#allocation11 + $0xd0] ss:$8 sps:$4 sm:$0xff]  }
 0x156   :  { %1529 = vmatprep.subr.bf16.mxu1 %v3767_v38  ;;  %v3936_v38 = vld [vmem:[#allocation11 + $0xe4] ss:$8 sps:$4 sm:$0xff]  }
 0x159   :  { %1530 = vmatpush1.bf16.msra.mxu1 %v3765_v40  ;;  %v3834_v40 = vld [vmem:[#allocation7 + $0x4c8] ss:$16 sps:$4 sm:$0xff]  }
 0x15a   :  { %1531 = vmatprep.subr.bf16.mxu1 %v3770_v61  ;;  %v3842_v61 = vld [vmem:[#allocation7 + $0x4ec] ss:$16 sps:$4 sm:$0xff]  }
 0x15d   :  { %1532 = vmatpush1.bf16.msra.mxu1 %v3768_v41  ;;  %v3934_v41 = vld [vmem:[#allocation11 + $0xe0] ss:$8 sps:$4 sm:$0xff]  }
 0x15e   :  { %1533 = vmatprep.subr.bf16.mxu1 %v3773_v42  ;;  %v3939_v42 = vld [vmem:[#allocation11 + $0xf4] ss:$8 sps:$4 sm:$0xff]  }
 0x161   :  { %1534 = vmatpush1.bf16.msra.mxu1 %v3771_v43  ;;  %v3840_v43 = vld [vmem:[#allocation7 + $0x4e8] ss:$16 sps:$4 sm:$0xff]  }
 0x162   :  { %1535 = vmatprep.subr.bf16.mxu1 %v3776_v44  ;;  %v3846_v44 = vld [vmem:[#allocation7 + $0x50c] ss:$16 sps:$4 sm:$0xff]  }
 0x165   :  { %1536 = vmatpush1.bf16.msra.mxu1 %v3774_v47  ;;  %v3844_v47 = vld [vmem:[#allocation7 + $0x508] ss:$16 sps:$4 sm:$0xff]  }
 0x166   :  { %1537 = vmatprep.subr.bf16.mxu1 %v3779_v49  ;;  %v3847_v49 = vld [vmem:[#allocation7 + $0x528] ss:$16 sps:$4 sm:$0xff]  }
 0x169   :  { %1538 = vmatpush1.bf16.msra.mxu1 %v3777_v52  ;;  %v3855_v52 = vld [vmem:[#allocation7 + $0x56c] ss:$16 sps:$4 sm:$0xff]  }
 0x16a   :  { %1539 = vmatprep.subr.bf16.mxu1 %v3782_v53  ;;  %v3853_v53 = vld [vmem:[#allocation7 + $0x568] ss:$16 sps:$4 sm:$0xff]  }
 0x16d   :  { %1540 = vmatpush1.bf16.msra.mxu1 %v3780_v57 }
 0x16e   :  { %1541 = vmatprep.subr.bf16.mxu1 %v3785_v13  ;;  %v3856_v13 = vld [vmem:[#allocation7 + $0x588] ss:$16 sps:$4 sm:$0xff]  }
 0x171   :  { %1542 = vmatpush1.bf16.msra.mxu1 %v3783_v60 }
 0x172   :  { %1543 = vmatprep.subr.bf16.mxu1 %v3788_v62  ;;  %v3859_v62 = vld [vmem:[#allocation7 + $0x5a8] ss:$16 sps:$4 sm:$0xff]  }
 0x175   :  { %1544 = vmatpush1.bf16.msra.mxu1 %v3786_v1  ;;  %v3867_v1 = vld [vmem:[#allocation7 + $0x5ec] ss:$16 sps:$4 sm:$0xff]  }
 0x176   :  { %1545 = vmatprep.subr.bf16.mxu1 %v3791_v2  ;;  %v3865_v2 = vld [vmem:[#allocation7 + $0x5e8] ss:$16 sps:$4 sm:$0xff]  }
 0x179   :  { %1546 = vmatpush1.bf16.msra.mxu1 %v3789_v5  ;;  %v3873_v5 = vld [vmem:[#allocation8 + $0x2c] ss:$16 sps:$4 sm:$0xff]  }
 0x17a   :  { %1547 = vmatprep.subr.bf16.mxu1 %v3794_v6  ;;  %v4101_v6 = vld [vmem:[#allocation2 + $0x10] ss:$24 sps:$4 sm:$0xff]  }
 0x17d   :  { %1548 = vmatpush1.bf16.msra.mxu1 %v3792_v11  ;;  %v335_v11 = vlaneseq }
 0x17e   :  { %1560 = vmatprep.subr.bf16.mxu1 %v3800_v12  ;;  %v3874_v12 = vld [vmem:[#allocation8 + $0x48] ss:$16 sps:$4 sm:$0xff]  }
 0x17f   :  { %v4506_v15 = vshrl.u32 %v335_v11, 7  ;;  %v3960_v11 = vld [vmem:[#allocation11 + $0x164] ss:$8 sps:$4 sm:$0xff]  }
 0x180   :  { %1550 = vmatmul.mubr.bf16.vlgmr.msra.gmra.mrb[4].mxu1 %v4490_v39  ;;  %v3927_v39 = vld [vmem:[#allocation11 + $0xb4] ss:$8 sps:$4 sm:$0xff]  }
 0x181   :  { %1561 = vmatpush1.bf16.msra.mxu1 %v3798_v16  ;;  %1592 = vmatprep.mubr.bf16.mxu1 %v4100_v21  ;;  %v3877_v16 = vld [vmem:[#allocation8 + $0x68] ss:$16 sps:$4 sm:$0xff]   ;;  %v4509_v18 = vsub.s32 0, %v4506_v15  ;;  %v3885_v21 = vld [vmem:[#allocation8 + $0xac] ss:$16 sps:$4 sm:$0xff]  }
 0x182   :  { %1562 = vmatprep.subr.bf16.mxu1 %v3806_v17  ;;  %2405 = vmatprep.subr.bf16.mxu0 %v3927_v39  ;;  %v3882_v17 = vld [vmem:[#allocation8 + $0x8c] ss:$16 sps:$4 sm:$0xff]  }
 0x183   :  { %2406 = vmatpush1.bf16.msra.mxu0 %v3925_v30  ;;  %v3886_v30 = vld [vmem:[#allocation8 + $0xc8] ss:$16 sps:$4 sm:$0xff]  }
 0x184   :  { %2407 = vmatprep.subr.bf16.mxu0 %v3930_v31 }
 0x185   :  { %1563 = vmatpush1.bf16.msra.mxu1 %v3804_v20  ;;  %v4517_v20 = vsub.s32 1, %v4506_v15 }
 0x186   :  { %1564 = vmatprep.subr.bf16.mxu1 %v3812_v22 }
 0x187   :  { %2408 = vmatpush1.bf16.msra.mxu0 %v3928_v34  ;;  %v3891_v34 = vld [vmem:[#allocation8 + $0xec] ss:$16 sps:$4 sm:$0xff]  }
 0x188   :  { %2409 = vmatprep.subr.bf16.mxu0 %v3933_v35 }
 0x189   :  { %1565 = vmatpush1.bf16.msra.mxu1 %v3810_v25  ;;  %v3888_v25 = vld [vmem:[#allocation8 + $0xcc] ss:$16 sps:$4 sm:$0xff]  }
 0x18a   :  { %1566 = vmatprep.subr.bf16.mxu1 %v3818_v26 }
 0x18b   :  { %2410 = vmatpush1.bf16.msra.mxu0 %v3931_v55 }
 0x18c   :  { %2411 = vmatprep.subr.bf16.mxu0 %v3936_v38  ;;  %v3889_v38 = vld [vmem:[#allocation8 + $0xe8] ss:$16 sps:$4 sm:$0xff]  }
 0x18d   :  { %1567 = vmatpush1.bf16.msra.mxu1 %v3816_v28 }
 0x18e   :  { %1568 = vmatprep.subr.bf16.mxu1 %v3824_v29 }
 0x18f   :  { %2412 = vmatpush1.bf16.msra.mxu0 %v3934_v41 }
 0x190   :  { %2413 = vmatprep.subr.bf16.mxu0 %v3939_v42 }
 0x191   :  { %1569 = vmatpush1.bf16.msra.mxu1 %v3822_v32 }
 0x192   :  { %1570 = vmatprep.subr.bf16.mxu1 %v3830_v33 }
 0x193   :  { %2414 = vmatpush1.bf16.msra.mxu0 %v3937_v45  ;;  %v4533_v45 = vld [vmem:[%s4581_s5] sm:$0xf] }
 0x194   :  { %2426 = vmatprep.subr.bf16.mxu0 %v3942_v46  ;;  %v1642_v46 = vrot.slane %v4533_v45, %v4509_v18 }
 0x195   :  { %1571 = vmatpush1.bf16.msra.mxu1 %v3828_v36 }
 0x196   :  { %1572 = vmatprep.subr.bf16.mxu1 %v3836_v37 }
 0x199   :  { %1573 = vmatpush1.bf16.msra.mxu1 %v3834_v40 }
 0x19a   :  { %1574 = vmatprep.subr.bf16.mxu1 %v3842_v61 }
 0x19c   :  { %v1465_v56 = vpop.f32.mrb[0].mxu0 }
 0x19d   :  { %1575 = vmatpush1.bf16.msra.mxu1 %v3840_v43  ;;  %v4501_v57 = vpop.f32.mrb[1].mxu0 }
 0x19e   :  { %1576 = vmatprep.subr.bf16.mxu1 %v3846_v44  ;;  %v4503_v58 = vpop.f32.mrb[2].mxu0 }
 0x19f   :  { %v1471_v60 = vpop.f32.mrb[3].mxu0 }
 0x1a1   :  { %1577 = vmatpush1.bf16.msra.mxu1 %v3844_v47  ;;  %v1646_v47 = vrot.slane %v4533_v45, %v4517_v20 }
 0x1a2   :  { %1578 = vmatprep.subr.bf16.mxu1 %v3849_v48 }
 0x1a5   :  { %1579 = vmatpush1.bf16.msra.mxu1 %v3847_v49 }
 0x1a6   :  { %1580 = vmatprep.subr.bf16.mxu1 %v3852_v50 }
 0x1a9   :  { %1581 = vmatpush1.bf16.msra.mxu1 %v3850_v51 }
 0x1aa   :  { %1582 = vmatprep.subr.bf16.mxu1 %v3855_v52 }
 0x1ad   :  { %1583 = vmatpush1.bf16.msra.mxu1 %v3853_v53 }
 0x1ae   :  { %1584 = vmatprep.subr.bf16.mxu1 %v3858_v54 }
 0x1b1   :  { %1585 = vmatpush1.bf16.msra.mxu1 %v3856_v13 }
 0x1b2   :  { %1586 = vmatprep.subr.bf16.mxu1 %v3861_v59 }
 0x1b5   :  { %1587 = vmatpush1.bf16.msra.mxu1 %v3859_v62  ;;  %v3940_v62 = vld [vmem:[#allocation11 + $0x100] ss:$8 sps:$4 sm:$0xff]  }
 0x1b6   :  { %1588 = vmatprep.subr.bf16.mxu1 %v3864_v63  ;;  %v3945_v63 = vld [vmem:[#allocation11 + $0x114] ss:$8 sps:$4 sm:$0xff]  }
 0x1b9   :  { %1589 = vmatpush1.bf16.msra.mxu1 %v3862_v0  ;;  %v3943_v0 = vld [vmem:[#allocation11 + $0x110] ss:$8 sps:$4 sm:$0xff]  }
 0x1ba   :  { %1590 = vmatprep.subr.bf16.mxu1 %v3867_v1  ;;  %v3948_v1 = vld [vmem:[#allocation11 + $0x124] ss:$8 sps:$4 sm:$0xff]  }
 0x1bd   :  { %1591 = vmatpush1.bf16.msra.mxu1 %v3865_v2  ;;  %v3946_v2 = vld [vmem:[#allocation11 + $0x120] ss:$8 sps:$4 sm:$0xff]  }
 0x1be   :  { %1868 = vmatprep.subr.bf16.mxu1 %v3870_v3  ;;  %v3951_v3 = vld [vmem:[#allocation11 + $0x134] ss:$8 sps:$4 sm:$0xff]  }
 0x1c0   :  { %1593 = vmatmul.mubr.bf16.vlgmr.msra.gmra.mrb[4].mxu1 %v4101_v6  ;;  %v3952_v6 = vld [vmem:[#allocation11 + $0x140] ss:$8 sps:$4 sm:$0xff]  }
 0x1c1   :  { %1869 = vmatpush1.bf16.msra.mxu1 %v3868_v4  ;;  %1900 = vmatprep.mubr.bf16.mxu1 %v4303_v10  ;;  %v4514_v10 = vld [vmem:[%s4579_s3] sm:$0xf]  ;;  %v3949_v4 = vld [vmem:[#allocation11 + $0x130] ss:$8 sps:$4 sm:$0xff]  }
 0x1c2   :  { %1870 = vmatprep.subr.bf16.mxu1 %v3873_v5  ;;  %v338_v22 = vrot.slane %v4514_v10, %v4509_v18  ;;  %v342_v23 = vrot.slane %v4514_v10, %v4517_v20  ;;  %v3954_v5 = vld [vmem:[#allocation11 + $0x144] ss:$8 sps:$4 sm:$0xff]  }
 0x1c5   :  { %1871 = vmatpush1.bf16.msra.mxu1 %v3871_v7  ;;  %v3957_v7 = vld [vmem:[#allocation11 + $0x154] ss:$8 sps:$4 sm:$0xff]  }
 0x1c6   :  { %1872 = vmatprep.subr.bf16.mxu1 %v3876_v8  ;;  %v3955_v8 = vld [vmem:[#allocation11 + $0x150] ss:$8 sps:$4 sm:$0xff]  }
 0x1c9   :  { %1873 = vmatpush1.bf16.msra.mxu1 %v3874_v12  ;;  %v3958_v12 = vld [vmem:[#allocation11 + $0x160] ss:$8 sps:$4 sm:$0xff]  }
 0x1ca   :  { %1874 = vmatprep.subr.bf16.mxu1 %v3879_v14  ;;  %v3963_v14 = vld [vmem:[#allocation11 + $0x174] ss:$8 sps:$4 sm:$0xff]  }
 0x1cd   :  { %1875 = vmatpush1.bf16.msra.mxu1 %v3877_v16  ;;  %v3961_v16 = vld [vmem:[#allocation11 + $0x170] ss:$8 sps:$4 sm:$0xff]  }
 0x1ce   :  { %1876 = vmatprep.subr.bf16.mxu1 %v3882_v17  ;;  %v3964_v17 = vld [vmem:[#allocation11 + $0x180] ss:$8 sps:$4 sm:$0xff]  }
 0x1d1   :  { %1877 = vmatpush1.bf16.msra.mxu1 %v3880_v19  ;;  %v3966_v19 = vld [vmem:[#allocation11 + $0x184] ss:$8 sps:$4 sm:$0xff]  }
 0x1d2   :  { %1878 = vmatprep.subr.bf16.mxu1 %v3885_v21  ;;  %v3969_v21 = vld [vmem:[#allocation11 + $0x194] ss:$8 sps:$4 sm:$0xff]  }
 0x1d3   :  { %v1422_v26 = vpop.f32.mrb[0].mxu1 }
 0x1d4   :  { %v3493_v27 = vadd.f32 %v1422_v26, %v338_v22  ;;  %v1424_v39 = vpop.f32.mrb[1].mxu1  ;;  %v3973_v26 = vld [vmem:[#allocation11 + $0x1b0] ss:$8 sps:$4 sm:$0xff]  }
 0x1d5   :  { %v3495_v28 = vadd.f32 %v1424_v39, %v342_v23  ;;  %v1426_v29 = vpop.f32.mrb[2].mxu1  ;;  %1879 = vmatpush1.bf16.msra.mxu1 %v3883_v24  ;;  %v3970_v24 = vld [vmem:[#allocation11 + $0x1a0] ss:$8 sps:$4 sm:$0xff]  }
 0x1d6   :  { %v3497_v31 = vadd.f32 %v1426_v29, %v338_v22  ;;  %v3494_v32 = vadd.f32 %v3493_v27, %v1465_v56  ;;  %v1428_v33 = vpop.f32.mrb[3].mxu1  ;;  %1880 = vmatprep.subr.bf16.mxu1 %v3888_v25  ;;  %v3967_v22 = vld [vmem:[#allocation11 + $0x190] ss:$8 sps:$4 sm:$0xff]   ;;  %v3975_v25 = vld [vmem:[#allocation11 + $0x1b4] ss:$8 sps:$4 sm:$0xff]  }
 0x1d7   :  { %v3499_v35 = vadd.f32 %v1428_v33, %v342_v23  ;;  %v3496_v36 = vadd.f32 %v3495_v28, %v4501_v57  ;;  %v3972_v23 = vld [vmem:[#allocation11 + $0x1a4] ss:$8 sps:$4 sm:$0xff]   ;;  %v3976_v39 = vld [vmem:[#allocation11 + $0x1c0] ss:$8 sps:$4 sm:$0xff]   ;;  %v3981_v28 = vld [vmem:[#allocation11 + $0x1d4] ss:$8 sps:$4 sm:$0xff]  }
 0x1d8   :  { %v3498_v37 = vadd.f32 %v3497_v31, %v4503_v58  ;;  %v1911_v40 = vmax.f32 %v3494_v32, 0.0  ;;  %v3978_v27 = vld [vmem:[#allocation11 + $0x1c4] ss:$8 sps:$4 sm:$0xff]   ;;  %v3979_v29 = vld [vmem:[#allocation11 + $0x1d0] ss:$8 sps:$4 sm:$0xff]  }
 0x1d9   :  { %v3500_v55 = vadd.f32 %v3499_v35, %v1471_v60  ;;  %1881 = vmatpush1.bf16.msra.mxu1 %v3886_v30  ;;  %v1912_v41 = vmax.f32 %v3496_v36, 0.0  ;;  %v3984_v30 = vld [vmem:[#allocation11 + $0x1e4] ss:$8 sps:$4 sm:$0xff]   ;;  %v3982_v31 = vld [vmem:[#allocation11 + $0x1e0] ss:$8 sps:$4 sm:$0xff]   ;;  %v345_v35 = vsub.s32 2, %v4506_v15 }
 0x1da   :  { %v1915_v61 = vmax.f32 %v3498_v37, 0.0  ;;  %1882 = vmatprep.subr.bf16.mxu1 %v3891_v34  ;;  %v3987_v32 = vld [vmem:[#allocation11 + $0x1f4] ss:$8 sps:$4 sm:$0xff]   ;;  %v3985_v33 = vld [vmem:[#allocation11 + $0x1f0] ss:$8 sps:$4 sm:$0xff]   ;;  %v349_v36 = vsub.s32 3, %v4506_v15 }
 0x1db   :  { %v1916_v42 = vmax.f32 %v3500_v55, 0.0  ;;  %v3990_v34 = vld [vmem:[#allocation10 + $0x4] ss:$8 sps:$4 sm:$0xff]   ;;  %v346_v37 = vrot.slane %v4514_v10, %v345_v35  ;;  %v1650_v15 = vrot.slane %v4533_v45, %v345_v35  ;;  %v4012_v35 = vld [vmem:[#allocation10 + $0x80] ss:$8 sps:$4 sm:$0xff]  }
 0x1dc   :  { %v4525_v43 = vpack.c.bf16 %v1915_v61, %v1911_v40  ;;  %v350_v55 = vrot.slane %v4514_v10, %v349_v36  ;;  %v1654_v10 = vrot.slane %v4533_v45, %v349_v36  ;;  %v4085_v45 = vld [vmem:[#allocation13] sm:$0xff]   ;;  %v4017_v36 = vld [vmem:[#allocation10 + $0x94] ss:$8 sps:$4 sm:$0xff]  }
 0x1dd   :  { %v4527_v44 = vpack.c.bf16 %v1916_v42, %v1912_v41  ;;  %1883 = vmatpush1.bf16.msra.mxu1 %v3889_v38 }
 0x1e0   :  { %1901 = vmatmul.mubr.bf16.vlgmr.msra.gmra.mrb[8].mxu1 %v4494_v9 }
 0x1e5   :  { %v1859_v48 = vpop.f32.mrb[4].mxu0 }
 0x1e6   :  { %v1860_v49 = vadd.f32 %v1859_v48, %v1642_v46  ;;  %v1861_v50 = vpop.f32.mrb[5].mxu0 }
 0x1e7   :  { %v1862_v51 = vadd.f32 %v1861_v50, %v1646_v47  ;;  %v1863_v52 = vpop.f32.mrb[6].mxu0 }
 0x1e8   :  { %v1923_v53 = vmax.f32 %v1860_v49, 0.0  ;;  %v1864_v54 = vadd.f32 %v1863_v52, %v1642_v46  ;;  %v1865_v56 = vpop.f32.mrb[7].mxu0 }
 0x1e9   :  { %v1924_v9 = vmax.f32 %v1862_v51, 0.0  ;;  %v1866_v57 = vadd.f32 %v1865_v56, %v1646_v47 }
 0x1ea   :  { %v1927_v13 = vmax.f32 %v1864_v54, 0.0 }
 0x1eb   :  { %v1928_v58 = vmax.f32 %v1866_v57, 0.0 }
 0x1ec   :  { %v1931_v59 = vpack.c.bf16 %v1927_v13, %v1923_v53 }
 0x1ed   :  { %v1932_v60 = vpack.c.bf16 %v1928_v58, %v1924_v9 }
 0x1ef   :  { %2415 = vmatprep.mubr.bf16.mxu0 %v1932_v60 }
 0x1f0   :  { %2416 = vmatmul.mubr.bf16.vlgmr.msra.gmra.mrb[8].mxu0 %v1931_v59 }
 0x1f1   :  { %2427 = vmatpush1.bf16.msra.mxu0 %v3940_v62 }
 0x1f2   :  { %2428 = vmatprep.subr.bf16.mxu0 %v3945_v63 }
 0x1f5   :  { %2429 = vmatpush1.bf16.msra.mxu0 %v3943_v0 }
 0x1f6   :  { %2430 = vmatprep.subr.bf16.mxu0 %v3948_v1 }
 0x1f9   :  { %2431 = vmatpush1.bf16.msra.mxu0 %v3946_v2 }
 0x1fa   :  { %2432 = vmatprep.subr.bf16.mxu0 %v3951_v3 }
 0x1fd   :  { %2433 = vmatpush1.bf16.msra.mxu0 %v3949_v4 }
 0x1fe   :  { %2434 = vmatprep.subr.bf16.mxu0 %v3954_v5  ;;  %v3988_v5 = vld [vmem:[#allocation10] ss:$8 sps:$4 sm:$0xff]  }
 0x201   :  { %2435 = vmatpush1.bf16.msra.mxu0 %v3952_v6  ;;  %v3993_v6 = vld [vmem:[#allocation10 + $0x14] ss:$8 sps:$4 sm:$0xff]  }
 0x202   :  { %2436 = vmatprep.subr.bf16.mxu0 %v3957_v7  ;;  %v4084_v7 = vld [vmem:[#allocation13 + $0x40] sm:$0xff]  }
 0x203   :  { %3471 = vmatprep.subr.bf16.mxu1 %v4084_v7  ;;  %v4066_v7 = vld [vmem:[#allocation10 + $0x1a0] ss:$8 sps:$4 sm:$0xff]  }
 0x204   :  { %3472 = vmatpush3.bf16.msra.mxu1 %v4085_v45  ;;  %v4071_v45 = vld [vmem:[#allocation10 + $0x1b4] ss:$8 sps:$4 sm:$0xff]  }
 0x205   :  { %2437 = vmatpush1.bf16.msra.mxu0 %v3955_v8  ;;  %v4086_v8 = vld [vmem:[#allocation13 + $0x48] sm:$0xff]  }
 0x206   :  { %2438 = vmatprep.subr.bf16.mxu0 %v3960_v11  ;;  %v3991_v11 = vld [vmem:[#allocation10 + $0x10] ss:$8 sps:$4 sm:$0xff]   ;;  %3473 = vmatprep.subr.bf16.mxu1 %v4086_v8 }
 0x207   :  { %v4069_v8 = vld [vmem:[#allocation10 + $0x1b0] ss:$8 sps:$4 sm:$0xff]  }
 0x209   :  { %2439 = vmatpush1.bf16.msra.mxu0 %v3958_v12  ;;  %v3996_v12 = vld [vmem:[#allocation10 + $0x24] ss:$8 sps:$4 sm:$0xff]  }
 0x20a   :  { %2440 = vmatprep.subr.bf16.mxu0 %v3963_v14  ;;  %v4087_v14 = vld [vmem:[#allocation13 + $0x8] sm:$0xff]  }
 0x20b   :  { %3474 = vmatpush3.bf16.msra.mxu1 %v4087_v14  ;;  %v4077_v14 = vld [vmem:[#allocation10 + $0x1d4] ss:$8 sps:$4 sm:$0xff]  }
 0x20d   :  { %2441 = vmatpush1.bf16.msra.mxu0 %v3961_v16  ;;  %v4088_v16 = vld [vmem:[#allocation13 + $0x50] sm:$0xff]  }
 0x20e   :  { %2442 = vmatprep.subr.bf16.mxu0 %v3966_v19  ;;  %v3999_v19 = vld [vmem:[#allocation10 + $0x34] ss:$8 sps:$4 sm:$0xff]   ;;  %3475 = vmatprep.subr.bf16.mxu1 %v4088_v16  ;;  %v4075_v16 = vld [vmem:[#allocation10 + $0x1d0] ss:$8 sps:$4 sm:$0xff]  }
 0x211   :  { %2443 = vmatpush1.bf16.msra.mxu0 %v3964_v17  ;;  %v3994_v17 = vld [vmem:[#allocation10 + $0x20] ss:$8 sps:$4 sm:$0xff]  }
 0x212   :  { %2444 = vmatprep.subr.bf16.mxu0 %v3969_v21  ;;  %v4089_v21 = vld [vmem:[#allocation13 + $0x10] sm:$0xff]  }
 0x213   :  { %3476 = vmatpush3.bf16.msra.mxu1 %v4089_v21  ;;  %v4083_v21 = vld [vmem:[#allocation10 + $0x1f4] ss:$8 sps:$4 sm:$0xff]  }
 0x215   :  { %2445 = vmatpush1.bf16.msra.mxu0 %v3967_v22  ;;  %v4090_v22 = vld [vmem:[#allocation13 + $0x58] sm:$0xff]  }
 0x216   :  { %2446 = vmatprep.subr.bf16.mxu0 %v3972_v23  ;;  %v3997_v23 = vld [vmem:[#allocation10 + $0x30] ss:$8 sps:$4 sm:$0xff]   ;;  %3477 = vmatprep.subr.bf16.mxu1 %v4090_v22 }
 0x217   :  { %v4081_v22 = vld [vmem:[#allocation10 + $0x1f0] ss:$8 sps:$4 sm:$0xff]  }
 0x219   :  { %2447 = vmatpush1.bf16.msra.mxu0 %v3970_v24  ;;  %v4091_v24 = vld [vmem:[#allocation13 + $0x18] sm:$0xff]  }
 0x21a   :  { %2448 = vmatprep.subr.bf16.mxu0 %v3975_v25  ;;  %v4092_v25 = vld [vmem:[#allocation13 + $0x60] sm:$0xff]   ;;  %3478 = vmatpush3.bf16.msra.mxu1 %v4091_v24  ;;  %v4097_v24 = vld [vmem:[#allocation13 + $0x30] sm:$0xff]  }
 0x21b   :  { %3479 = vmatprep.subr.bf16.mxu1 %v4092_v25  ;;  %v4098_v25 = vld [vmem:[#allocation13 + $0x78] sm:$0xff]  }
 0x21d   :  { %2449 = vmatpush1.bf16.msra.mxu0 %v3973_v26  ;;  %v4000_v26 = vld [vmem:[#allocation10 + $0x40] ss:$8 sps:$4 sm:$0xff]  }
 0x21e   :  { %2450 = vmatprep.subr.bf16.mxu0 %v3978_v27  ;;  %v4005_v27 = vld [vmem:[#allocation10 + $0x54] ss:$8 sps:$4 sm:$0xff]  }
 0x221   :  { %2451 = vmatpush1.bf16.msra.mxu0 %v3976_v39  ;;  %v4093_v39 = vld [vmem:[#allocation13 + $0x20] sm:$0xff]  }
 0x222   :  { %2452 = vmatprep.subr.bf16.mxu0 %v3981_v28  ;;  %v4094_v28 = vld [vmem:[#allocation13 + $0x68] sm:$0xff]   ;;  %3480 = vmatpush3.bf16.msra.mxu1 %v4093_v39 }
 0x223   :  { %3481 = vmatprep.subr.bf16.mxu1 %v4094_v28 }
 0x225   :  { %2453 = vmatpush1.bf16.msra.mxu0 %v3979_v29  ;;  %v4003_v29 = vld [vmem:[#allocation10 + $0x50] ss:$8 sps:$4 sm:$0xff]  }
 0x226   :  { %2454 = vmatprep.subr.bf16.mxu0 %v3984_v30  ;;  %v4008_v30 = vld [vmem:[#allocation10 + $0x64] ss:$8 sps:$4 sm:$0xff]  }
 0x229   :  { %2455 = vmatpush1.bf16.msra.mxu0 %v3982_v31  ;;  %v4006_v31 = vld [vmem:[#allocation10 + $0x60] ss:$8 sps:$4 sm:$0xff]  }
 0x22a   :  { %2456 = vmatprep.subr.bf16.mxu0 %v3987_v32  ;;  %v4011_v32 = vld [vmem:[#allocation10 + $0x74] ss:$8 sps:$4 sm:$0xff]  }
 0x22d   :  { %2457 = vmatpush1.bf16.msra.mxu0 %v3985_v33  ;;  %v4009_v33 = vld [vmem:[#allocation10 + $0x70] ss:$8 sps:$4 sm:$0xff]  }
 0x22e   :  { %2789 = vmatprep.subr.bf16.mxu0 %v3990_v34  ;;  %v4014_v34 = vld [vmem:[#allocation10 + $0x84] ss:$8 sps:$4 sm:$0xff]  }
 0x293   :  { %v1594_v38 = vpop.f32.mrb[4].mxu1 }
 0x294   :  { %v3501_v40 = vadd.f32 %v1594_v38, %v346_v37  ;;  %v1596_v61 = vpop.f32.mrb[5].mxu1  ;;  %v4018_v38 = vld [vmem:[#allocation10 + $0xa0] ss:$8 sps:$4 sm:$0xff]  }
 0x295   :  { %v3502_v41 = vadd.f32 %v1596_v61, %v350_v55  ;;  %v1598_v42 = vpop.f32.mrb[6].mxu1  ;;  %v4021_v61 = vld [vmem:[#allocation10 + $0xb0] ss:$8 sps:$4 sm:$0xff]  }
 0x296   :  { %v3503_v46 = vadd.f32 %v1598_v42, %v346_v37  ;;  %v1600_v47 = vpop.f32.mrb[7].mxu1  ;;  %v1913_v49 = vmax.f32 %v3501_v40, 0.0  ;;  %v4015_v37 = vld [vmem:[#allocation10 + $0x90] ss:$8 sps:$4 sm:$0xff]   ;;  %v4023_v40 = vld [vmem:[#allocation10 + $0xb4] ss:$8 sps:$4 sm:$0xff]  }
 0x297   :  { %v3504_v48 = vadd.f32 %v1600_v47, %v350_v55  ;;  %v1914_v51 = vmax.f32 %v3502_v41, 0.0  ;;  %v4020_v55 = vld [vmem:[#allocation10 + $0xa4] ss:$8 sps:$4 sm:$0xff]   ;;  %v4024_v42 = vld [vmem:[#allocation10 + $0xc0] ss:$8 sps:$4 sm:$0xff]  }
 0x298   :  { %v1917_v50 = vmax.f32 %v3503_v46, 0.0  ;;  %v4026_v41 = vld [vmem:[#allocation10 + $0xc4] ss:$8 sps:$4 sm:$0xff]   ;;  %v4029_v46 = vld [vmem:[#allocation10 + $0xd4] ss:$8 sps:$4 sm:$0xff]  }
 0x299   :  { %v1918_v52 = vmax.f32 %v3504_v48, 0.0  ;;  %v4027_v47 = vld [vmem:[#allocation10 + $0xd0] ss:$8 sps:$4 sm:$0xff]   ;;  %v4032_v48 = vld [vmem:[#allocation10 + $0xe4] ss:$8 sps:$4 sm:$0xff]  }
 0x29a   :  { %v4543_v53 = vpack.c.bf16 %v1917_v50, %v1913_v49  ;;  %v4030_v49 = vld [vmem:[#allocation10 + $0xe0] ss:$8 sps:$4 sm:$0xff]   ;;  %v4035_v50 = vld [vmem:[#allocation10 + $0xf4] ss:$8 sps:$4 sm:$0xff]  }
 0x29b   :  { %v4545_v54 = vpack.c.bf16 %v1918_v52, %v1914_v51  ;;  %v4033_v51 = vld [vmem:[#allocation10 + $0xf0] ss:$8 sps:$4 sm:$0xff]   ;;  %v4038_v52 = vld [vmem:[#allocation10 + $0x104] ss:$8 sps:$4 sm:$0xff]  }
 0x2b3   :  { %v1902_v56 = vpop.f32.mrb[8].mxu1 }
 0x2b4   :  { %v1903_v9 = vadd.f32 %v1902_v56, %v1650_v15  ;;  %v1904_v57 = vpop.f32.mrb[9].mxu1  ;;  %v4039_v56 = vld [vmem:[#allocation10 + $0x110] ss:$8 sps:$4 sm:$0xff]  }
 0x2b5   :  { %v1905_v13 = vadd.f32 %v1904_v57, %v1654_v10  ;;  %v1906_v58 = vpop.f32.mrb[10].mxu1  ;;  %v4042_v57 = vld [vmem:[#allocation10 + $0x120] ss:$8 sps:$4 sm:$0xff]  }
 0x2b6   :  { %v1907_v59 = vadd.f32 %v1906_v58, %v1650_v15  ;;  %v1908_v60 = vpop.f32.mrb[11].mxu1  ;;  %v1925_v63 = vmax.f32 %v1903_v9, 0.0  ;;  %v4036_v15 = vld [vmem:[#allocation10 + $0x100] ss:$8 sps:$4 sm:$0xff]   ;;  %v4044_v9 = vld [vmem:[#allocation10 + $0x124] ss:$8 sps:$4 sm:$0xff]  }
 0x2b7   :  { %v1909_v62 = vadd.f32 %v1908_v60, %v1654_v10  ;;  %v1926_v1 = vmax.f32 %v1905_v13, 0.0  ;;  %v4041_v10 = vld [vmem:[#allocation10 + $0x114] ss:$8 sps:$4 sm:$0xff]   ;;  %v4045_v58 = vld [vmem:[#allocation10 + $0x130] ss:$8 sps:$4 sm:$0xff]  }
 0x2b8   :  { %v1929_v0 = vmax.f32 %v1907_v59, 0.0  ;;  %v4047_v13 = vld [vmem:[#allocation10 + $0x134] ss:$8 sps:$4 sm:$0xff]   ;;  %v4050_v59 = vld [vmem:[#allocation10 + $0x144] ss:$8 sps:$4 sm:$0xff]  }
 0x2b9   :  { %v1930_v2 = vmax.f32 %v1909_v62, 0.0  ;;  %v4048_v60 = vld [vmem:[#allocation10 + $0x140] ss:$8 sps:$4 sm:$0xff]   ;;  %v4053_v62 = vld [vmem:[#allocation10 + $0x154] ss:$8 sps:$4 sm:$0xff]  }
 0x2ba   :  { %v1933_v3 = vpack.c.bf16 %v1929_v0, %v1925_v63  ;;  %v4056_v63 = vld [vmem:[#allocation10 + $0x164] ss:$8 sps:$4 sm:$0xff]   ;;  %v4059_v0 = vld [vmem:[#allocation10 + $0x174] ss:$8 sps:$4 sm:$0xff]  }
 0x2bb   :  { %v1934_v4 = vpack.c.bf16 %v1930_v2, %v1926_v1  ;;  %v4057_v1 = vld [vmem:[#allocation10 + $0x170] ss:$8 sps:$4 sm:$0xff]   ;;  %v4062_v2 = vld [vmem:[#allocation10 + $0x184] ss:$8 sps:$4 sm:$0xff]  }
 0x2bd   :  { %2458 = vmatprep.mubr.bf16.mxu0 %v1934_v4  ;;  %v4065_v4 = vld [vmem:[#allocation10 + $0x194] ss:$8 sps:$4 sm:$0xff]  }
 0x2be   :  { %2459 = vmatmul.mubr.bf16.vlgmr.msra.gmra.mrb[8].mxu0 %v1933_v3  ;;  %v4060_v3 = vld [vmem:[#allocation10 + $0x180] ss:$8 sps:$4 sm:$0xff]  }
 0x2bf   :  { %2790 = vmatpush1.bf16.msra.mxu0 %v3988_v5  ;;  %2821 = vmatprep.mubr.bf16.mxu0 %v4527_v44  ;;  %v4002_v44 = vld [vmem:[#allocation10 + $0x44] ss:$8 sps:$4 sm:$0xff]   ;;  %v4063_v5 = vld [vmem:[#allocation10 + $0x190] ss:$8 sps:$4 sm:$0xff]  }
 0x2c0   :  { %2791 = vmatprep.subr.bf16.mxu0 %v3993_v6  ;;  %v4068_v6 = vld [vmem:[#allocation10 + $0x1a4] ss:$8 sps:$4 sm:$0xff]  }
 0x2c3   :  { %2792 = vmatpush1.bf16.msra.mxu0 %v3991_v11  ;;  %v4074_v11 = vld [vmem:[#allocation10 + $0x1c4] ss:$8 sps:$4 sm:$0xff]  }
 0x2c4   :  { %2793 = vmatprep.subr.bf16.mxu0 %v3996_v12  ;;  %v4072_v12 = vld [vmem:[#allocation10 + $0x1c0] ss:$8 sps:$4 sm:$0xff]  }
 0x2c7   :  { %2794 = vmatpush1.bf16.msra.mxu0 %v3994_v17  ;;  %v4080_v17 = vld [vmem:[#allocation10 + $0x1e4] ss:$8 sps:$4 sm:$0xff]  }
 0x2c8   :  { %2795 = vmatprep.subr.bf16.mxu0 %v3999_v19  ;;  %v4078_v19 = vld [vmem:[#allocation10 + $0x1e0] ss:$8 sps:$4 sm:$0xff]  }
 0x2cb   :  { %2796 = vmatpush1.bf16.msra.mxu0 %v3997_v23  ;;  %v4095_v23 = vld [vmem:[#allocation13 + $0x28] sm:$0xff]  }
 0x2cc   :  { %2797 = vmatprep.subr.bf16.mxu0 %v4002_v44  ;;  %3482 = vmatpush3.bf16.msra.mxu1 %v4095_v23  ;;  %v4096_v44 = vld [vmem:[#allocation13 + $0x70] sm:$0xff]  }
 0x2cd   :  { %3483 = vmatprep.subr.bf16.mxu1 %v4096_v44 }
 0x2cf   :  { %2798 = vmatpush1.bf16.msra.mxu0 %v4000_v26  ;;  %v4099_v26 = vld [vmem:[#allocation13 + $0x38] sm:$0xff]  }
 0x2d0   :  { %2799 = vmatprep.subr.bf16.mxu0 %v4005_v27  ;;  %3484 = vmatpush3.bf16.msra.mxu1 %v4097_v24  ;;  %v2875_v27 = vld [vmem:[%s4584_s8] sm:$0x3] }
 0x2d1   :  { %3485 = vmatprep.subr.bf16.mxu1 %v4098_v25  ;;  %v2880_v39 = vrot.slane %v2875_v27, %v4509_v18  ;;  %v2884_v28 = vrot.slane %v2875_v27, %v4517_v20  ;;  %v3454_v18 = vld [vmem:[%s4586_s10] ss:$0 sm:$0xff] }
 0x2d3   :  { %2800 = vmatpush1.bf16.msra.mxu0 %v4003_v29 }
 0x2d4   :  { %2801 = vmatprep.subr.bf16.mxu0 %v4008_v30  ;;  %3486 = vmatpush3.bf16.msra.mxu1 %v4099_v26 }
 0x2d7   :  { %2802 = vmatpush1.bf16.msra.mxu0 %v4006_v31 }
 0x2d8   :  { %2803 = vmatprep.subr.bf16.mxu0 %v4011_v32 }
 0x2db   :  { %2804 = vmatpush1.bf16.msra.mxu0 %v4009_v33 }
 0x2dc   :  { %2805 = vmatprep.subr.bf16.mxu0 %v4014_v34 }
 0x2df   :  { %2806 = vmatpush1.bf16.msra.mxu0 %v4012_v35 }
 0x2e0   :  { %2807 = vmatprep.subr.bf16.mxu0 %v4017_v36 }
 0x2e3   :  { %2808 = vmatpush1.bf16.msra.mxu0 %v4015_v37 }
 0x2e4   :  { %2809 = vmatprep.subr.bf16.mxu0 %v4020_v55 }
 0x2e7   :  { %2810 = vmatpush1.bf16.msra.mxu0 %v4018_v38 }
 0x2e8   :  { %2811 = vmatprep.subr.bf16.mxu0 %v4023_v40 }
 0x2eb   :  { %2812 = vmatpush1.bf16.msra.mxu0 %v4021_v61 }
 0x2ec   :  { %2813 = vmatprep.subr.bf16.mxu0 %v4026_v41 }
 0x2ef   :  { %2814 = vmatpush1.bf16.msra.mxu0 %v4024_v42 }
 0x2f0   :  { %2815 = vmatprep.subr.bf16.mxu0 %v4029_v46 }
 0x2f3   :  { %2816 = vmatpush1.bf16.msra.mxu0 %v4027_v47 }
 0x2f4   :  { %2817 = vmatprep.subr.bf16.mxu0 %v4032_v48 }
 0x2f7   :  { %2818 = vmatpush1.bf16.msra.mxu0 %v4030_v49 }
 0x2f8   :  { %2819 = vmatprep.subr.bf16.mxu0 %v4035_v50 }
 0x2fb   :  { %2820 = vmatpush1.bf16.msra.mxu0 %v4033_v51 }
 0x2fc   :  { %2832 = vmatprep.subr.bf16.mxu0 %v4038_v52 }
 0x2fe   :  { %2822 = vmatmul.mubr.bf16.vlgmr.msra.gmra.mrb[8].mxu0 %v4525_v43  ;;  %v4051_v43 = vld [vmem:[#allocation10 + $0x150] ss:$8 sps:$4 sm:$0xff]  }
 0x2ff   :  { %2833 = vmatpush1.bf16.msra.mxu0 %v4036_v15  ;;  %2864 = vmatprep.mubr.bf16.mxu0 %v4545_v54  ;;  %v4054_v54 = vld [vmem:[#allocation10 + $0x160] ss:$8 sps:$4 sm:$0xff]  }
 0x300   :  { %2834 = vmatprep.subr.bf16.mxu0 %v4041_v10 }
 0x303   :  { %2835 = vmatpush1.bf16.msra.mxu0 %v4039_v56 }
 0x304   :  { %2836 = vmatprep.subr.bf16.mxu0 %v4044_v9 }
 0x307   :  { %2837 = vmatpush1.bf16.msra.mxu0 %v4042_v57 }
 0x308   :  { %2838 = vmatprep.subr.bf16.mxu0 %v4047_v13 }
 0x30b   :  { %2839 = vmatpush1.bf16.msra.mxu0 %v4045_v58 }
 0x30c   :  { %2840 = vmatprep.subr.bf16.mxu0 %v4050_v59 }
 0x30f   :  { %2841 = vmatpush1.bf16.msra.mxu0 %v4048_v60 }
 0x310   :  { %2842 = vmatprep.subr.bf16.mxu0 %v4053_v62 }
 0x313   :  { %2843 = vmatpush1.bf16.msra.mxu0 %v4051_v43 }
 0x314   :  { %2844 = vmatprep.subr.bf16.mxu0 %v4056_v63 }
 0x317   :  { %2845 = vmatpush1.bf16.msra.mxu0 %v4054_v54 }
 0x318   :  { %2846 = vmatprep.subr.bf16.mxu0 %v4059_v0 }
 0x31b   :  { %2847 = vmatpush1.bf16.msra.mxu0 %v4057_v1 }
 0x31c   :  { %2848 = vmatprep.subr.bf16.mxu0 %v4062_v2 }
 0x31f   :  { %2849 = vmatpush1.bf16.msra.mxu0 %v4060_v3 }
 0x320   :  { %2850 = vmatprep.subr.bf16.mxu0 %v4065_v4 }
 0x323   :  { %2851 = vmatpush1.bf16.msra.mxu0 %v4063_v5 }
 0x324   :  { %2852 = vmatprep.subr.bf16.mxu0 %v4068_v6 }
 0x327   :  { %2853 = vmatpush1.bf16.msra.mxu0 %v4066_v7 }
 0x328   :  { %2854 = vmatprep.subr.bf16.mxu0 %v4071_v45 }
 0x32b   :  { %2855 = vmatpush1.bf16.msra.mxu0 %v4069_v8 }
 0x32c   :  { %2856 = vmatprep.subr.bf16.mxu0 %v4074_v11 }
 0x32f   :  { %2857 = vmatpush1.bf16.msra.mxu0 %v4072_v12 }
 0x330   :  { %2858 = vmatprep.subr.bf16.mxu0 %v4077_v14 }
 0x333   :  { %2859 = vmatpush1.bf16.msra.mxu0 %v4075_v16 }
 0x334   :  { %2860 = vmatprep.subr.bf16.mxu0 %v4080_v17 }
 0x337   :  { %2861 = vmatpush1.bf16.msra.mxu0 %v4078_v19 }
 0x338   :  { %2862 = vmatprep.subr.bf16.mxu0 %v4083_v21 }
 0x33b   :  { %2863 = vmatpush1.bf16.msra.mxu0 %v4081_v22 }
 0x33e   :  { %2865 = vmatmul.mubr.bf16.vlgmr.msra.gmra.mrb[8].mxu0 %v4543_v53 }
 0x411   :  { %v2866_v29 = vpop.f32.mrb[8].mxu0 }
 0x412   :  { %v2887_v53 = vadd.f32 %v2880_v39, %v2866_v29  ;;  %v2868_v30 = vpop.f32.mrb[9].mxu0 }
 0x413   :  { %v2888_v31 = vadd.f32 %v2884_v28, %v2868_v30  ;;  %v2870_v32 = vpop.f32.mrb[10].mxu0 }
 0x414   :  { %v2889_v33 = vadd.f32 %v2880_v39, %v2870_v32  ;;  %v2872_v34 = vpop.f32.mrb[11].mxu0  ;;  %v2891_v36 = vmax.f32 %v2887_v53, 0.0 }
 0x415   :  { %v2890_v35 = vadd.f32 %v2884_v28, %v2872_v34  ;;  %v2892_v55 = vmax.f32 %v2888_v31, 0.0 }
 0x416   :  { %v2893_v37 = vmax.f32 %v2889_v33, 0.0 }
 0x417   :  { %v2894_v38 = vmax.f32 %v2890_v35, 0.0 }
 0x418   :  { %v2895_v40 = vpack.c.bf16 %v2893_v37, %v2891_v36 }
 0x419   :  { %v2896_v61 = vpack.c.bf16 %v2894_v38, %v2892_v55 }
 0x41b   :  { %3064 = vmatprep.mubr.bf16.mxu1 %v2896_v61 }
 0x41c   :  { %3065 = vmatmul.mubr.bf16.vlgmr.msra.gmra.mrb[12].mxu1 %v2895_v40 }
 0x4ef   :  { %v3487_v41 = vpop.f32.mrb[12].mxu1 }
 0x4f0   :  { %v3488_v20 = vpop.f32.mrb[13].mxu1 }
 0x4f1   :  { %v3489_v42 = vadd.f32 %v3488_v20, %v3487_v41  ;;  %v3490_v46 = vpop.f32.mrb[14].mxu1 }
 0x4f2   :  { %v3491_v47 = vpop.f32.mrb[15].mxu1 }
 0x4f3   :  { %v3067_v48 = vadd.f32 %v3489_v42, %v3454_v18  ;;  %v3492_v49 = vadd.f32 %v3491_v47, %v3490_v46 }
 0x4f5   :  { %3073 = vst [vmem:[#allocation14] sm:$0xff] %v3067_v48  ;;  %v3070_v50 = vadd.f32 %v3492_v49, %v3454_v18 }
 0x4f7   :  { %3074 = vst [vmem:[#allocation14 + $0x8] sm:$0xff] %v3070_v50 }
 0x4f8   :  { %4267 = shalt.err (!%p4264_p4)
}
 0x4f9   :  { %s4268_s12 = scalar_lea.hbm %s4587_s11, 256 }
 0x4fa   :  { %p4269_p5 = scmp.ne.s32.totalorder %s4587_s11, %s4268_s12  ;;  %p4272_p6 = scmp.lt.u32.totalorder %s4268_s12, %s4587_s11 }
 0x4fc   :  { %p4274_p7 = pnand %p4272_p6, %p4269_p5 }
 0x4fe   :  { %4277 = shalt.err (!%p4274_p7)
}
 0x4ff   :  { %3086 = dma.vmem_to_hbm [thread:$0]  %s3081_s23, 256, %s4587_s11, [#allocation4], %s4296_s13, %s4296_s13, %s4297_s21  }
 0x500   :  { %4286 = dma.done.wait [#allocation4], 256  }
 0x501   :  { %4287 = vsyncadd [#allocation4], 4294967040 }
 0x502   :  { %3090 = vsyncpa [#allocation3], 1 }
 0x503   :  { %3091 = vsyncpa [#allocation6], 1 }
 0x504   :  { %3092 = vsyncpa [#allocation9], 1 }
 0x505   :  { %3093 = vsyncpa [#allocation12], 1 }
 0x506   :  { %3094 = vsyncpa [#allocation4], 1 }

</bundles_post_ra>
